<compile_context>
chip_gen: v6e
topology: v6e:2x2x1
jax: 0.10.0
libtpu: 0.0.40
codegen_flags: <defaults>
</compile_context>

<pallas_src>
import math
from functools import partial

import jax
import jax.numpy as jnp
import numpy as np
from jax.experimental import pallas as pl
from jax.experimental.pallas import tpu as pltpu


# ---------------------------------------------------------------------------
# The single fused kernel: FAM -> ARM (hoisted off the N^2 replication, edge_proj
# folded into V) -> BatchNorm2d(N*N) -> lane-dense store.
# ---------------------------------------------------------------------------
def gem_kernel(B, N, D,
               cf_ref, gf_ref,
               wq1_ref, bq1_ref, wkv1_ref, bkv1_ref,
               warm_ref, barm_ref,
               o_ref):
    f32 = jnp.float32
    C = cf_ref.shape[-1]
    C2 = C // 2
    ND = N * D
    NN = N * N
    scale = float(C2) ** -0.5
    eps2 = 1e-24                       # (1e-12)^2  -> F.normalize eps, squared

    cf = cf_ref[...]                   # (B*N*D, C)   rows ordered (b, n, d)
    gf = gf_ref[...]                   # (B*D, C)     rows ordered (b, d)

    # ---------------- FAM ----------------
    # q from class_feature; fused [k|v] from global_feature: single 2-D MXU matmuls.
    q1 = jnp.dot(cf, wq1_ref[...], preferred_element_type=f32) + bq1_ref[...]      # (B*ND, C2)
    kv1 = jnp.dot(gf, wkv1_ref[...], preferred_element_type=f32) + bkv1_ref[...]   # (B*D, C2+C)
    k1 = kv1[:, :C2]                   # (B*D, C2)
    v1 = kv1[:, C2:]                   # (B*D, C)

    # F.normalize(p=2, dim=1): dim=1 is the N axis of the (B, N, D, *) tensors.
    q1_4 = q1.reshape(B, N, D, C2)
    q1_ss = jnp.sum(q1_4 * q1_4, axis=1, keepdims=True)                            # (B,1,D,C2)
    qn1 = (q1_4 * jax.lax.rsqrt(jnp.maximum(q1_ss, eps2))).reshape(B, ND, C2)
    # key/value are replicated over N, so the dim=1 norm is sqrt(N * k^2) elementwise.
    kn1 = (k1 * jax.lax.rsqrt(jnp.maximum(float(N) * (k1 * k1), eps2))).reshape(B, D, C2)
    v1_3 = v1.reshape(B, D, C)

    dots1 = jnp.einsum('bme,bfe->bmf', qn1, kn1, preferred_element_type=f32) * scale   # (B,ND,D)
    attn1 = jax.nn.softmax(dots1, axis=-1)
    feat = jnp.einsum('bmf,bfc->bmc', attn1, v1_3, preferred_element_type=f32)          # (B,ND,C)

    # ---------------- ARM (projections hoisted off the N^2 replication) --------------
    # Fused [q2 | k2 | v2@We^T (+be)] in one matmul; edge_proj is folded into the value
    # path (bias passes through because every softmax row sums to 1).
    qkv2 = (jnp.dot(feat.reshape(B * ND, C), warm_ref[...], preferred_element_type=f32)
            + barm_ref[...])                                                        # (B*ND, 2C2+C)
    q2 = qkv2[:, :C2]
    k2 = qkv2[:, C2:2 * C2]
    v2p = qkv2[:, 2 * C2:]             # == edge_proj(linear_v2(feat))

    # F.normalize over the replicated N^2 axis  =>  norm = sqrt(N * sum_over_N(x^2)).
    q2_4 = q2.reshape(B, N, D, C2)
    q2_ss = jnp.sum(q2_4 * q2_4, axis=1, keepdims=True)
    qn2 = (q2_4 * jax.lax.rsqrt(jnp.maximum(float(N) * q2_ss, eps2))).reshape(B, ND, C2)
    k2_4 = k2.reshape(B, N, D, C2)
    k2_ss = jnp.sum(k2_4 * k2_4, axis=1, keepdims=True)
    kn2 = (k2_4 * jax.lax.rsqrt(jnp.maximum(float(N) * k2_ss, eps2))).reshape(B * N, D, C2)
    v2p_g = v2p.reshape(B * N, D, C)

    # Group axis g = (b, i): broadcast the query rows (j, d) over the target class i and
    # run ONE batched einsum for the dots and ONE for the aggregation — no Python loop,
    # no concatenate, no per-block temporaries kept live.
    qn2_g = jnp.broadcast_to(qn2[:, None], (B, N, ND, C2)).reshape(B * N, ND, C2)
    dots2 = jnp.einsum('gme,gfe->gmf', qn2_g, kn2, preferred_element_type=f32) * scale  # (B*N,ND,D)
    attn2 = jax.nn.softmax(dots2, axis=-1)
    proj = jnp.einsum('gmf,gfc->gmc', attn2, v2p_g, preferred_element_type=f32)          # (B*N,ND,C)

    # Rows are ordered (b, i, j, d): a pure row-regroup gives the torch (B, N*N, D, C)
    # layout (tile-exact, no relayout).
    proj4 = proj.reshape(B, NN, D, C)
    # Lane-dense (B, NN, D*C) slab (256 lanes) via static sublane slices + lane concat,
    # so the final HBM store is unmasked and the BN reduces are single lane reductions.
    proj_ld = jnp.concatenate([proj4[:, :, d, :] for d in range(D)], axis=-1)            # (B,NN,DC)

    # ---------------- BatchNorm2d(NN): training batch stats, weight=1 / bias=0 --------
    # Two-pass (centered) variance to avoid E[x^2]-E[x]^2 cancellation.
    cnt = float(B * D * C)
    mean = jnp.sum(jnp.sum(proj_ld, axis=2, keepdims=True), axis=0, keepdims=True) / cnt  # (1,NN,1)
    cent = proj_ld - mean
    var = jnp.sum(jnp.sum(cent * cent, axis=2, keepdims=True), axis=0, keepdims=True) / cnt
    o_ref[...] = cent * jax.lax.rsqrt(var + 1e-5)


# ---------------------------------------------------------------------------
# One-time weight fusion (hoisted out of the per-call path).
# ---------------------------------------------------------------------------
def prepare_gem_params(params):
    C2, C = params["wq1"].shape
    wq1t = params["wq1"].T                                                    # (C, C2)
    bq1 = params["bq1"].reshape(1, C2)
    wkv1 = jnp.concatenate([params["wk1"].T, params["wv1"].T], axis=1)        # (C, C2+C)
    bkv1 = jnp.concatenate([params["bk1"], params["bv1"]]).reshape(1, C2 + C)
    wet = params["we"].T
    wv2e = params["wv2"].T @ wet                       # fold edge_proj into ARM value path
    bv2e = params["bv2"] @ wet + params["be"]          # be passes through the softmax
    warm = jnp.concatenate([params["wq2"].T, params["wk2"].T, wv2e], axis=1)  # (C, 2*C2+C)
    barm = jnp.concatenate([params["bq2"], params["bk2"], bv2e]).reshape(1, 2 * C2 + C)
    return tuple(jnp.asarray(w, jnp.float32)
                 for w in (wq1t, bq1, wkv1, bkv1, warm, barm))


def _full_spec(shape):
    nd = len(shape)
    return pl.BlockSpec(shape, lambda i, _nd=nd: (0,) * _nd)


# ---------------------------------------------------------------------------
# Forward wrapper: one pallas_call, whole batch in a single grid step.
# ---------------------------------------------------------------------------
@jax.jit
def gem_forward(class_feature, global_feature, fused_weights):
    B, N, D, C = class_feature.shape
    NN = N * N
    DC = D * C

    # Contiguous views (free): rows ordered (b, n, d) / (b, d).
    cf2 = class_feature.reshape(B * N * D, C)
    gf2 = global_feature.reshape(B * D, C)

    edge_ld = pl.pallas_call(
        partial(gem_kernel, B, N, D),
        out_shape=jax.ShapeDtypeStruct((B, NN, DC), jnp.float32),
        grid=(1,),
        in_specs=[_full_spec(cf2.shape), _full_spec(gf2.shape)]
                 + [_full_spec(w.shape) for w in fused_weights],
        out_specs=_full_spec((B, NN, DC)),
        compiler_params=pltpu.CompilerParams(dimension_semantics=("arbitrary",)),
    )(cf2, gf2, *fused_weights)

    # Module-faithful (B, N*N, D, C) view; consumers wanting to skip this relayout can
    # use the lane-dense (B, N*N, D*C) array directly.
    return edge_ld.reshape(B, NN, D, C)


# ---------------------------------------------------------------------------
# Pure-JAX reference (faithful mirror of the PyTorch forward, with the full
# N^2 replication) to validate the hoisted algebra, the edge_proj fold and BN.
# ---------------------------------------------------------------------------
def gem_reference(class_feature, global_feature, params):
    B, N, D, C = class_feature.shape
    scale = (C // 2) ** -0.5
    gfe = jnp.broadcast_to(global_feature[:, None], (B, N, D, C))

    def ca(y, x, wq, bq, wk, bk, wv, bv):
        q = jnp.einsum("bmdc,ec->bmde", y, wq) + bq
        k = jnp.einsum("bmdc,ec->bmde", x, wk) + bk
        v = jnp.einsum("bmdc,ec->bmde", x, wv) + bv
        qn = q / jnp.maximum(jnp.sqrt(jnp.sum(q * q, axis=1, keepdims=True)), 1e-12)
        kn = k / jnp.maximum(jnp.sqrt(jnp.sum(k * k, axis=1, keepdims=True)), 1e-12)
        dots = jnp.einsum("bmde,bmfe->bmdf", qn, kn) * scale
        attn = jax.nn.softmax(dots, axis=-1)
        return jnp.einsum("bmdf,bmfc->bmdc", attn, v)

    feat = ca(class_feature, gfe,
              params["wq1"], params["bq1"], params["wk1"], params["bk1"],
              params["wv1"], params["bv1"])
    feat_end = jnp.broadcast_to(feat[:, :, None], (B, N, N, D, C)).reshape(B, N * N, D, C)
    feat_start = jnp.broadcast_to(feat[:, None], (B, N, N, D, C)).reshape(B, N * N, D, C)
    feat2 = ca(feat_start, feat_end,
               params["wq2"], params["bq2"], params["wk2"], params["bk2"],
               params["wv2"], params["bv2"])
    proj = jnp.einsum("bmdc,ec->bmde", feat2, params["we"]) + params["be"]
    mean = jnp.mean(proj, axis=(0, 2, 3), keepdims=True)
    var = jnp.mean((proj - mean) ** 2, axis=(0, 2, 3), keepdims=True)
    return (proj - mean) / jnp.sqrt(var + 1e-5)


# ---------------------------------------------------------------------------
if __name__ == "__main__":
    B, N, D, C = 2, 4, 8, 32       # batch, num_classes, spatial, in_channels
    C2 = C // 2

    key = jax.random.PRNGKey(0)
    ks = jax.random.split(key, 16)

    std_qk = math.sqrt(2.0 / C2)
    std_v = math.sqrt(2.0 / C)
    bound = 1.0 / math.sqrt(C)     # torch Linear default bias init bound (fan_in = C)

    params = {
        # FAM
        "wq1": std_qk * jax.random.normal(ks[0], (C2, C), jnp.float32),
        "bq1": jax.random.uniform(ks[1], (C2,), jnp.float32, -bound, bound),
        "wk1": std_qk * jax.random.normal(ks[2], (C2, C), jnp.float32),
        "bk1": jax.random.uniform(ks[3], (C2,), jnp.float32, -bound, bound),
        "wv1": std_v * jax.random.normal(ks[4], (C, C), jnp.float32),
        "bv1": jax.random.uniform(ks[5], (C,), jnp.float32, -bound, bound),
        # ARM
        "wq2": std_qk * jax.random.normal(ks[6], (C2, C), jnp.float32),
        "bq2": jax.random.uniform(ks[7], (C2,), jnp.float32, -bound, bound),
        "wk2": std_qk * jax.random.normal(ks[8], (C2, C), jnp.float32),
        "bk2": jax.random.uniform(ks[9], (C2,), jnp.float32, -bound, bound),
        "wv2": std_v * jax.random.normal(ks[10], (C, C), jnp.float32),
        "bv2": jax.random.uniform(ks[11], (C,), jnp.float32, -bound, bound),
        # edge_proj
        "we": std_v * jax.random.normal(ks[12], (C, C), jnp.float32),
        "be": jax.random.uniform(ks[13], (C,), jnp.float32, -bound, bound),
    }

    class_feature = jax.random.normal(ks[14], (B, N, D, C), jnp.float32)
    global_feature = jax.random.normal(ks[15], (B, D, C), jnp.float32)

    fused = prepare_gem_params(params)                 # one-time weight fusion
    fused = jax.block_until_ready(fused)

    edge = gem_forward(class_feature, global_feature, fused)
    edge = jax.block_until_ready(edge)

    ref = gem_reference(class_feature, global_feature, params)
    np.testing.assert_allclose(np.asarray(edge), np.asarray(ref), rtol=2e-4, atol=2e-4)

    print("KERNEL_OK")
</pallas_src>

<mosaic_0001>
module attributes {stable_mosaic.version = 11 : i64} {
  func.func @gem_kernel(%arg0: i32, %arg1: memref<64x32xf32, #tpu.memory_space<vmem>>, %arg2: memref<16x32xf32, #tpu.memory_space<vmem>>, %arg3: memref<32x16xf32, #tpu.memory_space<vmem>>, %arg4: memref<1x16xf32, #tpu.memory_space<vmem>>, %arg5: memref<32x48xf32, #tpu.memory_space<vmem>>, %arg6: memref<1x48xf32, #tpu.memory_space<vmem>>, %arg7: memref<32x64xf32, #tpu.memory_space<vmem>>, %arg8: memref<1x64xf32, #tpu.memory_space<vmem>>, %arg9: memref<2x16x256xf32, #tpu.memory_space<vmem>>) attributes {dimension_semantics = [#tpu.dimension_semantics<arbitrary>], iteration_bounds = array<i64: 1>, scalar_prefetch = 0 : i64, scratch_operands = 0 : i64, tpu.core_type = #tpu.core_type<tc>, window_params = [{pipeline_mode = #tpu.pipeline_mode<synchronous>, transform_indices = @transform_0, window_bounds = array<i64: 64, 32>}, {pipeline_mode = #tpu.pipeline_mode<synchronous>, transform_indices = @transform_1, window_bounds = array<i64: 16, 32>}, {pipeline_mode = #tpu.pipeline_mode<synchronous>, transform_indices = @transform_2, window_bounds = array<i64: 32, 16>}, {pipeline_mode = #tpu.pipeline_mode<synchronous>, transform_indices = @transform_3, window_bounds = array<i64: 1, 16>}, {pipeline_mode = #tpu.pipeline_mode<synchronous>, transform_indices = @transform_4, window_bounds = array<i64: 32, 48>}, {pipeline_mode = #tpu.pipeline_mode<synchronous>, transform_indices = @transform_5, window_bounds = array<i64: 1, 48>}, {pipeline_mode = #tpu.pipeline_mode<synchronous>, transform_indices = @transform_6, window_bounds = array<i64: 32, 64>}, {pipeline_mode = #tpu.pipeline_mode<synchronous>, transform_indices = @transform_7, window_bounds = array<i64: 1, 64>}, {pipeline_mode = #tpu.pipeline_mode<synchronous>, transform_indices = @transform_8, window_bounds = array<i64: 2, 16, 256>}]} {
    %c0 = arith.constant 0 : index
    %c0_0 = arith.constant 0 : index
    %0 = vector.load %arg1[%c0, %c0_0] : memref<64x32xf32, #tpu.memory_space<vmem>>, vector<64x32xf32>
    %c0_1 = arith.constant 0 : index
    %c0_2 = arith.constant 0 : index
    %1 = vector.load %arg2[%c0_1, %c0_2] : memref<16x32xf32, #tpu.memory_space<vmem>>, vector<16x32xf32>
    %c0_3 = arith.constant 0 : index
    %c0_4 = arith.constant 0 : index
    %2 = vector.load %arg3[%c0_3, %c0_4] : memref<32x16xf32, #tpu.memory_space<vmem>>, vector<32x16xf32>
    %cst = arith.constant dense<0.000000e+00> : vector<64x16xf32>
    %3 = tpu.matmul %0, %2, %cst {dimension_numbers = #tpu.dot_dimension_numbers<[1], [0], [0], [1], [0, 0, 1, 1], [], []>} : vector<64x32xf32>, vector<32x16xf32>, vector<64x16xf32> -> vector<64x16xf32>
    %c0_5 = arith.constant 0 : index
    %c0_6 = arith.constant 0 : index
    %4 = vector.load %arg4[%c0_5, %c0_6] : memref<1x16xf32, #tpu.memory_space<vmem>>, vector<1x16xf32>
    %5 = vector.broadcast %4 : vector<1x16xf32> to vector<64x16xf32>
    %6 = arith.addf %3, %5 : vector<64x16xf32>
    %c0_7 = arith.constant 0 : index
    %c0_8 = arith.constant 0 : index
    %7 = vector.load %arg5[%c0_7, %c0_8] : memref<32x48xf32, #tpu.memory_space<vmem>>, vector<32x48xf32>
    %cst_9 = arith.constant dense<0.000000e+00> : vector<16x48xf32>
    %8 = tpu.matmul %1, %7, %cst_9 {dimension_numbers = #tpu.dot_dimension_numbers<[1], [0], [0], [1], [0, 0, 1, 1], [], []>} : vector<16x32xf32>, vector<32x48xf32>, vector<16x48xf32> -> vector<16x48xf32>
    %c0_10 = arith.constant 0 : index
    %c0_11 = arith.constant 0 : index
    %9 = vector.load %arg6[%c0_10, %c0_11] : memref<1x48xf32, #tpu.memory_space<vmem>>, vector<1x48xf32>
    %10 = vector.broadcast %9 : vector<1x48xf32> to vector<16x48xf32>
    %11 = arith.addf %8, %10 : vector<16x48xf32>
    %12 = vector.extract_strided_slice %11 {offsets = [0, 0], sizes = [16, 16], strides = [1, 1]} : vector<16x48xf32> to vector<16x16xf32>
    %13 = vector.extract_strided_slice %11 {offsets = [0, 16], sizes = [16, 32], strides = [1, 1]} : vector<16x48xf32> to vector<16x32xf32>
    %14 = vector.shape_cast %6 : vector<64x16xf32> to vector<2x4x8x16xf32>
    %15 = arith.mulf %14, %14 : vector<2x4x8x16xf32>
    %cst_12 = arith.constant dense<0.000000e+00> : vector<2x8x16xf32>
    %16 = vector.multi_reduction <add>, %15, %cst_12 [1] : vector<2x4x8x16xf32> to vector<2x8x16xf32>
    %17 = vector.shape_cast %16 : vector<2x8x16xf32> to vector<2x1x8x16xf32>
    %cst_13 = arith.constant 1.000000e-24 : f32
    %18 = vector.broadcast %cst_13 : f32 to vector<2x1x8x16xf32>
    %19 = arith.maximumf %17, %18 : vector<2x1x8x16xf32>
    %20 = math.rsqrt %19 : vector<2x1x8x16xf32>
    %21 = vector.broadcast %20 : vector<2x1x8x16xf32> to vector<2x4x8x16xf32>
    %22 = arith.mulf %14, %21 : vector<2x4x8x16xf32>
    %23 = vector.shape_cast %22 : vector<2x4x8x16xf32> to vector<2x32x16xf32>
    %24 = arith.mulf %12, %12 : vector<16x16xf32>
    %cst_14 = arith.constant 4.000000e+00 : f32
    %25 = vector.broadcast %cst_14 : f32 to vector<16x16xf32>
    %26 = arith.mulf %25, %24 : vector<16x16xf32>
    %cst_15 = arith.constant 1.000000e-24 : f32
    %27 = vector.broadcast %cst_15 : f32 to vector<16x16xf32>
    %28 = arith.maximumf %26, %27 : vector<16x16xf32>
    %29 = math.rsqrt %28 : vector<16x16xf32>
    %30 = arith.mulf %12, %29 : vector<16x16xf32>
    %31 = vector.shape_cast %30 : vector<16x16xf32> to vector<2x8x16xf32>
    %32 = vector.shape_cast %13 : vector<16x32xf32> to vector<2x8x32xf32>
    "tpu.trace_start"() <{level = 10 : i32, message = "bme,bfe->bmf"}> : () -> ()
    %cst_16 = arith.constant dense<0.000000e+00> : vector<2x32x8xf32>
    %33 = tpu.matmul %23, %31, %cst_16 {dimension_numbers = #tpu.dot_dimension_numbers<[2], [2], [1], [1], [0, 0, 0, 1, 1, 1], [0], [0]>} : vector<2x32x16xf32>, vector<2x8x16xf32>, vector<2x32x8xf32> -> vector<2x32x8xf32>
    "tpu.trace_stop"() : () -> ()
    %cst_17 = arith.constant 2.500000e-01 : f32
    %34 = vector.broadcast %cst_17 : f32 to vector<2x32x8xf32>
    %35 = arith.mulf %33, %34 : vector<2x32x8xf32>
    %cst_18 = arith.constant dense<0xFF800000> : vector<2x32xf32>
    %36 = vector.multi_reduction <maximumf>, %35, %cst_18 [2] : vector<2x32x8xf32> to vector<2x32xf32>
    %cst_19 = arith.constant 0xFF800000 : f32
    %37 = vector.broadcast %cst_19 : f32 to vector<2x32xf32>
    %38 = arith.maximumf %37, %36 : vector<2x32xf32>
    %39 = vector.shape_cast %38 : vector<2x32xf32> to vector<2x32x1xf32>
    %40 = vector.broadcast %39 : vector<2x32x1xf32> to vector<2x32x8xf32>
    %41 = arith.subf %35, %40 : vector<2x32x8xf32>
    %42 = math.exp %41 : vector<2x32x8xf32>
    %cst_20 = arith.constant dense<0.000000e+00> : vector<2x32xf32>
    %43 = vector.multi_reduction <add>, %42, %cst_20 [2] : vector<2x32x8xf32> to vector<2x32xf32>
    %44 = vector.shape_cast %43 : vector<2x32xf32> to vector<2x32x1xf32>
    %45 = vector.broadcast %44 : vector<2x32x1xf32> to vector<2x32x8xf32>
    %46 = arith.divf %42, %45 : vector<2x32x8xf32>
    "tpu.trace_start"() <{level = 10 : i32, message = "bmf,bfc->bmc"}> : () -> ()
    %cst_21 = arith.constant dense<0.000000e+00> : vector<2x32x32xf32>
    %47 = tpu.matmul %46, %32, %cst_21 {dimension_numbers = #tpu.dot_dimension_numbers<[2], [1], [1], [2], [0, 0, 0, 1, 1, 2], [0], [0]>} : vector<2x32x8xf32>, vector<2x8x32xf32>, vector<2x32x32xf32> -> vector<2x32x32xf32>
    "tpu.trace_stop"() : () -> ()
    %48 = vector.shape_cast %47 : vector<2x32x32xf32> to vector<64x32xf32>
    %c0_22 = arith.constant 0 : index
    %c0_23 = arith.constant 0 : index
    %49 = vector.load %arg7[%c0_22, %c0_23] : memref<32x64xf32, #tpu.memory_space<vmem>>, vector<32x64xf32>
    %cst_24 = arith.constant dense<0.000000e+00> : vector<64x64xf32>
    %50 = tpu.matmul %48, %49, %cst_24 {dimension_numbers = #tpu.dot_dimension_numbers<[1], [0], [0], [1], [0, 0, 1, 1], [], []>} : vector<64x32xf32>, vector<32x64xf32>, vector<64x64xf32> -> vector<64x64xf32>
    %c0_25 = arith.constant 0 : index
    %c0_26 = arith.constant 0 : index
    %51 = vector.load %arg8[%c0_25, %c0_26] : memref<1x64xf32, #tpu.memory_space<vmem>>, vector<1x64xf32>
    %52 = vector.broadcast %51 : vector<1x64xf32> to vector<64x64xf32>
    %53 = arith.addf %50, %52 : vector<64x64xf32>
    %54 = vector.extract_strided_slice %53 {offsets = [0, 0], sizes = [64, 16], strides = [1, 1]} : vector<64x64xf32> to vector<64x16xf32>
    %55 = vector.extract_strided_slice %53 {offsets = [0, 16], sizes = [64, 16], strides = [1, 1]} : vector<64x64xf32> to vector<64x16xf32>
    %56 = vector.extract_strided_slice %53 {offsets = [0, 32], sizes = [64, 32], strides = [1, 1]} : vector<64x64xf32> to vector<64x32xf32>
    %57 = vector.shape_cast %54 : vector<64x16xf32> to vector<2x4x8x16xf32>
    %58 = arith.mulf %57, %57 : vector<2x4x8x16xf32>
    %cst_27 = arith.constant dense<0.000000e+00> : vector<2x8x16xf32>
    %59 = vector.multi_reduction <add>, %58, %cst_27 [1] : vector<2x4x8x16xf32> to vector<2x8x16xf32>
    %60 = vector.shape_cast %59 : vector<2x8x16xf32> to vector<2x1x8x16xf32>
    %cst_28 = arith.constant 4.000000e+00 : f32
    %61 = vector.broadcast %cst_28 : f32 to vector<2x1x8x16xf32>
    %62 = arith.mulf %61, %60 : vector<2x1x8x16xf32>
    %cst_29 = arith.constant 1.000000e-24 : f32
    %63 = vector.broadcast %cst_29 : f32 to vector<2x1x8x16xf32>
    %64 = arith.maximumf %62, %63 : vector<2x1x8x16xf32>
    %65 = math.rsqrt %64 : vector<2x1x8x16xf32>
    %66 = vector.broadcast %65 : vector<2x1x8x16xf32> to vector<2x4x8x16xf32>
    %67 = arith.mulf %57, %66 : vector<2x4x8x16xf32>
    %68 = vector.shape_cast %67 : vector<2x4x8x16xf32> to vector<2x32x16xf32>
    %69 = vector.shape_cast %55 : vector<64x16xf32> to vector<2x4x8x16xf32>
    %70 = arith.mulf %69, %69 : vector<2x4x8x16xf32>
    %cst_30 = arith.constant dense<0.000000e+00> : vector<2x8x16xf32>
    %71 = vector.multi_reduction <add>, %70, %cst_30 [1] : vector<2x4x8x16xf32> to vector<2x8x16xf32>
    %72 = vector.shape_cast %71 : vector<2x8x16xf32> to vector<2x1x8x16xf32>
    %cst_31 = arith.constant 4.000000e+00 : f32
    %73 = vector.broadcast %cst_31 : f32 to vector<2x1x8x16xf32>
    %74 = arith.mulf %73, %72 : vector<2x1x8x16xf32>
    %cst_32 = arith.constant 1.000000e-24 : f32
    %75 = vector.broadcast %cst_32 : f32 to vector<2x1x8x16xf32>
    %76 = arith.maximumf %74, %75 : vector<2x1x8x16xf32>
    %77 = math.rsqrt %76 : vector<2x1x8x16xf32>
    %78 = vector.broadcast %77 : vector<2x1x8x16xf32> to vector<2x4x8x16xf32>
    %79 = arith.mulf %69, %78 : vector<2x4x8x16xf32>
    %80 = vector.shape_cast %79 : vector<2x4x8x16xf32> to vector<8x8x16xf32>
    %81 = vector.shape_cast %56 : vector<64x32xf32> to vector<8x8x32xf32>
    %82 = vector.shape_cast %68 : vector<2x32x16xf32> to vector<2x1x32x16xf32>
    %83 = vector.shape_cast %82 : vector<2x1x32x16xf32> to vector<2x1x32x16xf32>
    %84 = vector.broadcast %83 : vector<2x1x32x16xf32> to vector<2x4x32x16xf32>
    %85 = vector.shape_cast %84 : vector<2x4x32x16xf32> to vector<8x32x16xf32>
    "tpu.trace_start"() <{level = 10 : i32, message = "gme,gfe->gmf"}> : () -> ()
    %cst_33 = arith.constant dense<0.000000e+00> : vector<8x32x8xf32>
    %86 = tpu.matmul %85, %80, %cst_33 {dimension_numbers = #tpu.dot_dimension_numbers<[2], [2], [1], [1], [0, 0, 0, 1, 1, 1], [0], [0]>} : vector<8x32x16xf32>, vector<8x8x16xf32>, vector<8x32x8xf32> -> vector<8x32x8xf32>
    "tpu.trace_stop"() : () -> ()
    %cst_34 = arith.constant 2.500000e-01 : f32
    %87 = vector.broadcast %cst_34 : f32 to vector<8x32x8xf32>
    %88 = arith.mulf %86, %87 : vector<8x32x8xf32>
    %cst_35 = arith.constant dense<0xFF800000> : vector<8x32xf32>
    %89 = vector.multi_reduction <maximumf>, %88, %cst_35 [2] : vector<8x32x8xf32> to vector<8x32xf32>
    %cst_36 = arith.constant 0xFF800000 : f32
    %90 = vector.broadcast %cst_36 : f32 to vector<8x32xf32>
    %91 = arith.maximumf %90, %89 : vector<8x32xf32>
    %92 = vector.shape_cast %91 : vector<8x32xf32> to vector<8x32x1xf32>
    %93 = vector.broadcast %92 : vector<8x32x1xf32> to vector<8x32x8xf32>
    %94 = arith.subf %88, %93 : vector<8x32x8xf32>
    %95 = math.exp %94 : vector<8x32x8xf32>
    %cst_37 = arith.constant dense<0.000000e+00> : vector<8x32xf32>
    %96 = vector.multi_reduction <add>, %95, %cst_37 [2] : vector<8x32x8xf32> to vector<8x32xf32>
    %97 = vector.shape_cast %96 : vector<8x32xf32> to vector<8x32x1xf32>
    %98 = vector.broadcast %97 : vector<8x32x1xf32> to vector<8x32x8xf32>
    %99 = arith.divf %95, %98 : vector<8x32x8xf32>
    "tpu.trace_start"() <{level = 10 : i32, message = "gmf,gfc->gmc"}> : () -> ()
    %cst_38 = arith.constant dense<0.000000e+00> : vector<8x32x32xf32>
    %100 = tpu.matmul %99, %81, %cst_38 {dimension_numbers = #tpu.dot_dimension_numbers<[2], [1], [1], [2], [0, 0, 0, 1, 1, 2], [0], [0]>} : vector<8x32x8xf32>, vector<8x8x32xf32>, vector<8x32x32xf32> -> vector<8x32x32xf32>
    "tpu.trace_stop"() : () -> ()
    %101 = vector.shape_cast %100 : vector<8x32x32xf32> to vector<2x16x8x32xf32>
    %102 = vector.extract_strided_slice %101 {offsets = [0, 0, 0, 0], sizes = [2, 16, 1, 32], strides = [1, 1, 1, 1]} : vector<2x16x8x32xf32> to vector<2x16x1x32xf32>
    %103 = vector.shape_cast %102 : vector<2x16x1x32xf32> to vector<2x16x32xf32>
    %104 = vector.extract_strided_slice %101 {offsets = [0, 0, 1, 0], sizes = [2, 16, 1, 32], strides = [1, 1, 1, 1]} : vector<2x16x8x32xf32> to vector<2x16x1x32xf32>
    %105 = vector.shape_cast %104 : vector<2x16x1x32xf32> to vector<2x16x32xf32>
    %106 = vector.extract_strided_slice %101 {offsets = [0, 0, 2, 0], sizes = [2, 16, 1, 32], strides = [1, 1, 1, 1]} : vector<2x16x8x32xf32> to vector<2x16x1x32xf32>
    %107 = vector.shape_cast %106 : vector<2x16x1x32xf32> to vector<2x16x32xf32>
    %108 = vector.extract_strided_slice %101 {offsets = [0, 0, 3, 0], sizes = [2, 16, 1, 32], strides = [1, 1, 1, 1]} : vector<2x16x8x32xf32> to vector<2x16x1x32xf32>
    %109 = vector.shape_cast %108 : vector<2x16x1x32xf32> to vector<2x16x32xf32>
    %110 = vector.extract_strided_slice %101 {offsets = [0, 0, 4, 0], sizes = [2, 16, 1, 32], strides = [1, 1, 1, 1]} : vector<2x16x8x32xf32> to vector<2x16x1x32xf32>
    %111 = vector.shape_cast %110 : vector<2x16x1x32xf32> to vector<2x16x32xf32>
    %112 = vector.extract_strided_slice %101 {offsets = [0, 0, 5, 0], sizes = [2, 16, 1, 32], strides = [1, 1, 1, 1]} : vector<2x16x8x32xf32> to vector<2x16x1x32xf32>
    %113 = vector.shape_cast %112 : vector<2x16x1x32xf32> to vector<2x16x32xf32>
    %114 = vector.extract_strided_slice %101 {offsets = [0, 0, 6, 0], sizes = [2, 16, 1, 32], strides = [1, 1, 1, 1]} : vector<2x16x8x32xf32> to vector<2x16x1x32xf32>
    %115 = vector.shape_cast %114 : vector<2x16x1x32xf32> to vector<2x16x32xf32>
    %116 = vector.extract_strided_slice %101 {offsets = [0, 0, 7, 0], sizes = [2, 16, 1, 32], strides = [1, 1, 1, 1]} : vector<2x16x8x32xf32> to vector<2x16x1x32xf32>
    %117 = vector.shape_cast %116 : vector<2x16x1x32xf32> to vector<2x16x32xf32>
    %118 = tpu.concatenate %103, %105, %107, %109, %111, %113, %115, %117 in 2 : vector<2x16x32xf32>, vector<2x16x32xf32>, vector<2x16x32xf32>, vector<2x16x32xf32>, vector<2x16x32xf32>, vector<2x16x32xf32>, vector<2x16x32xf32>, vector<2x16x32xf32> -> vector<2x16x256xf32>
    %cst_39 = arith.constant dense<0.000000e+00> : vector<2x16xf32>
    %119 = vector.multi_reduction <add>, %118, %cst_39 [2] : vector<2x16x256xf32> to vector<2x16xf32>
    %120 = vector.shape_cast %119 : vector<2x16xf32> to vector<2x16x1xf32>
    %cst_40 = arith.constant dense<0.000000e+00> : vector<16x1xf32>
    %121 = vector.multi_reduction <add>, %120, %cst_40 [0] : vector<2x16x1xf32> to vector<16x1xf32>
    %122 = vector.shape_cast %121 : vector<16x1xf32> to vector<1x16x1xf32>
    %cst_41 = arith.constant 5.120000e+02 : f32
    %123 = vector.broadcast %cst_41 : f32 to vector<1x16x1xf32>
    %124 = arith.divf %122, %123 : vector<1x16x1xf32>
    %125 = vector.broadcast %124 : vector<1x16x1xf32> to vector<2x16x256xf32>
    %126 = arith.subf %118, %125 : vector<2x16x256xf32>
    %127 = arith.mulf %126, %126 : vector<2x16x256xf32>
    %cst_42 = arith.constant dense<0.000000e+00> : vector<2x16xf32>
    %128 = vector.multi_reduction <add>, %127, %cst_42 [2] : vector<2x16x256xf32> to vector<2x16xf32>
    %129 = vector.shape_cast %128 : vector<2x16xf32> to vector<2x16x1xf32>
    %cst_43 = arith.constant dense<0.000000e+00> : vector<16x1xf32>
    %130 = vector.multi_reduction <add>, %129, %cst_43 [0] : vector<2x16x1xf32> to vector<16x1xf32>
    %131 = vector.shape_cast %130 : vector<16x1xf32> to vector<1x16x1xf32>
    %cst_44 = arith.constant 5.120000e+02 : f32
    %132 = vector.broadcast %cst_44 : f32 to vector<1x16x1xf32>
    %133 = arith.divf %131, %132 : vector<1x16x1xf32>
    %cst_45 = arith.constant 9.99999974E-6 : f32
    %134 = vector.broadcast %cst_45 : f32 to vector<1x16x1xf32>
    %135 = arith.addf %133, %134 : vector<1x16x1xf32>
    %136 = math.rsqrt %135 : vector<1x16x1xf32>
    %137 = vector.broadcast %136 : vector<1x16x1xf32> to vector<2x16x256xf32>
    %138 = arith.mulf %126, %137 : vector<2x16x256xf32>
    %c0_46 = arith.constant 0 : index
    %c0_47 = arith.constant 0 : index
    %c0_48 = arith.constant 0 : index
    %139 = vector.load %arg9[%c0_46, %c0_47, %c0_48] : memref<2x16x256xf32, #tpu.memory_space<vmem>>, vector<2x16x256xf32>
    tpu.vector_store %arg9[%c0_46, %c0_47, %c0_48], %138 {strides = array<i32>} : memref<2x16x256xf32, #tpu.memory_space<vmem>>, vector<2x16x256xf32>,
    return
  }
  func.func @transform_0(%arg0: i32) -> (i32, i32) {
    %c0_i32 = arith.constant 0 : i32
    %c0_i32_0 = arith.constant 0 : i32
    %c0_i32_1 = arith.constant 0 : i32
    return %c0_i32, %c0_i32_0 : i32, i32
  }
  func.func @transform_1(%arg0: i32) -> (i32, i32) {
    %c0_i32 = arith.constant 0 : i32
    %c0_i32_0 = arith.constant 0 : i32
    %c0_i32_1 = arith.constant 0 : i32
    return %c0_i32, %c0_i32_0 : i32, i32
  }
  func.func @transform_2(%arg0: i32) -> (i32, i32) {
    %c0_i32 = arith.constant 0 : i32
    %c0_i32_0 = arith.constant 0 : i32
    %c0_i32_1 = arith.constant 0 : i32
    return %c0_i32, %c0_i32_0 : i32, i32
  }
  func.func @transform_3(%arg0: i32) -> (i32, i32) {
    %c0_i32 = arith.constant 0 : i32
    %c0_i32_0 = arith.constant 0 : i32
    %c0_i32_1 = arith.constant 0 : i32
    return %c0_i32, %c0_i32_0 : i32, i32
  }
  func.func @transform_4(%arg0: i32) -> (i32, i32) {
    %c0_i32 = arith.constant 0 : i32
    %c0_i32_0 = arith.constant 0 : i32
    %c0_i32_1 = arith.constant 0 : i32
    return %c0_i32, %c0_i32_0 : i32, i32
  }
  func.func @transform_5(%arg0: i32) -> (i32, i32) {
    %c0_i32 = arith.constant 0 : i32
    %c0_i32_0 = arith.constant 0 : i32
    %c0_i32_1 = arith.constant 0 : i32
    return %c0_i32, %c0_i32_0 : i32, i32
  }
  func.func @transform_6(%arg0: i32) -> (i32, i32) {
    %c0_i32 = arith.constant 0 : i32
    %c0_i32_0 = arith.constant 0 : i32
    %c0_i32_1 = arith.constant 0 : i32
    return %c0_i32, %c0_i32_0 : i32, i32
  }
  func.func @transform_7(%arg0: i32) -> (i32, i32) {
    %c0_i32 = arith.constant 0 : i32
    %c0_i32_0 = arith.constant 0 : i32
    %c0_i32_1 = arith.constant 0 : i32
    return %c0_i32, %c0_i32_0 : i32, i32
  }
  func.func @transform_8(%arg0: i32) -> (i32, i32, i32) {
    %c0_i32 = arith.constant 0 : i32
    %c0_i32_0 = arith.constant 0 : i32
    %c0_i32_1 = arith.constant 0 : i32
    %c0_i32_2 = arith.constant 0 : i32
    return %c0_i32, %c0_i32_0, %c0_i32_1 : i32, i32, i32
  }
}

</mosaic_0001>

<bundles_post_ra>
// kernel: gem_forward.1
= control target key start
LH: loop header
LB: loop body
LE: loop exit
PB: predicated region body
PF: predicated region fallthrough
CT: control target
= control target key end

     0   :  { %13 = vsyncpa [#allocation3], 0  ;;  %s5725_s0 = inlined_call_operand.hbm [shape: f32[64,32], index: 0, kind: input, shape index: {}]   ;;  %s5726_s1 = inlined_call_operand.vmem [shape: f32[16,32], index: 1, kind: input, shape index: {}]   ;;  %s5727_s2 = inlined_call_operand.vmem [shape: f32[32,16], index: 2, kind: input, shape index: {}]   ;;  %s5728_s3 = inlined_call_operand.vmem [shape: f32[1,16], index: 3, kind: input, shape index: {}]   ;;  %s5729_s4 = inlined_call_operand.vmem [shape: f32[32,48], index: 4, kind: input, shape index: {}]   ;;  %s5730_s5 = inlined_call_operand.vmem [shape: f32[1,48], index: 5, kind: input, shape index: {}]   ;;  %s5731_s6 = inlined_call_operand.hbm [shape: f32[32,64], index: 6, kind: input, shape index: {}]   ;;  %s5732_s7 = inlined_call_operand.vmem [shape: f32[1,64], index: 7, kind: input, shape index: {}]   ;;  %s5733_s8 = inlined_call_operand.vmem [shape: f32[2,16,256], index: 8, kind: output, shape index: {}]  }
   0x1   :  { %14 = vsyncpa [#allocation5], 0  ;;  %s4337_s27 = smov [#allocation2]  }
   0x2   :  { %s20_s28 = sshll.u32 %s4337_s27, 4  ;;  %s21_s28 = int_to_ptr.vmem [resolvable:$true] %s20_s28 }
   0x3   :  { %s4301_s29 = scalar_lea.vmem %s21_s28, 1024  ;;  %p4306_p1 = scmp.lt.s32.totalorder %s21_s28, %s21_s28 }
   0x4   :  { %p4302_p0 = scmp.ne.s32.totalorder %s21_s28, %s4301_s29  ;;  %p4307_p2 = scmp.lt.s32.totalorder %s4301_s29, %s4301_s29 }
   0x6   :  { %p4308_p3 = por %p4307_p2, %p4306_p1 }
   0x8   :  { %p4309_p4 = pnand %p4308_p3, %p4302_p0 }
   0xa   :  { %4312 = shalt.err (!%p4309_p4)
}
   0xb   :  { %s4338_s30 = smov 128   ;;  %s4339_s9 = smov 8  }
   0xc   :  { %26 = dma.hbm_to_vmem [thread:$0]  %s5725_s0, 1024, %s21_s28, [#allocation3], %s4338_s30, %s4338_s30, %s4339_s9  }
   0xd   :  { %s4340_s12 = smov [#allocation4]  }
   0xe   :  { %s42_s13 = sshll.u32 %s4340_s12, 4  ;;  %s43_s13 = int_to_ptr.vmem [resolvable:$true] %s42_s13 }
   0xf   :  { %s4321_s14 = scalar_lea.vmem %s43_s13, 512  ;;  %p4326_p6 = scmp.lt.s32.totalorder %s43_s13, %s43_s13 }
  0x10   :  { %p4322_p5 = scmp.ne.s32.totalorder %s43_s13, %s4321_s14  ;;  %p4327_p7 = scmp.lt.s32.totalorder %s4321_s14, %s4321_s14 }
  0x12   :  { %p4328_p8 = por %p4327_p7, %p4326_p6 }
  0x14   :  { %p4329_p9 = pnand %p4328_p8, %p4322_p5 }
  0x16   :  { %4332 = shalt.err (!%p4329_p9)
}
  0x17   :  { %48 = dma.hbm_to_vmem [thread:$0]  %s5731_s6, 512, %s43_s13, [#allocation5], %s4338_s30, %s4338_s30, %s4339_s9  }
  0x18   :  { %4333 = dma.done.wait [#allocation3], 1024  }
  0x19   :  { %4334 = vsyncadd [#allocation3], 4294966272 }
  0x1a   :  { %4335 = dma.done.wait [#allocation5], 512  }
  0x1b   :  { %4336 = vsyncadd [#allocation5], 4294966784  ;;  %v70_v0 = vld [vmem:[%s5727_s2 + $0x18] sm:$0xff]  ;;  %v69_v2 = vld [vmem:[%s5727_s2 + $0x10] sm:$0xff]  ;;  %vm78_vm0 = vcmask 261120   ;;  %vm308_vm1 = vcmask 130048  }
  0x1c   :  { %v211_v1 = vld [vmem:[%s5729_s4 + $0x18] sm:$0xff]  ;;  %3894 = vmatprep.subr.mxu0 %v70_v0  ;;  %v210_v3 = vld [vmem:[%s5729_s4 + $0x10] sm:$0xff]  ;;  %v68_v4 = vld [vmem:[%s5727_s2 + $0x8] sm:$0xff]  ;;  %vm553_vm2 = vcmask 64512   ;;  %vm1020_vm3 = vcmask 261248   ;;  %vm3018_vm4 = vcmask 1041409  }
  0x1d   :  { %3914 = vmatprep.subr.mxu1 %v211_v1  ;;  %3895 = vmatpush3.msra.mxu0 %v70_v0  ;;  %v209_v5 = vld [vmem:[%s5729_s4 + $0x8] sm:$0xff]  ;;  %v67_v6 = vld [vmem:[%s5727_s2] sm:$0xff]  ;;  %v59_v12 = vld [vmem:[#allocation2 + $0x10] sm:$0xff]  ;;  %vm3021_vm5 = vcmask 1042434   ;;  %vm3024_vm6 = vcmask 1043459   ;;  %vm3027_vm7 = vcmask 1044484  }
  0x1e   :  { %3915 = vmatpush3.msra.mxu1 %v211_v1  ;;  %3896 = vmatprep.subr.mxu0 %v69_v2  ;;  %v208_v7 = vld [vmem:[%s5729_s4] sm:$0xff]  ;;  %v58_v10 = vld [vmem:[#allocation2 + $0x8] sm:$0xff]  ;;  %v60_v13 = vld [vmem:[#allocation2 + $0x18] sm:$0xff]  ;;  %vm3030_vm8 = vcmask 1045509   ;;  %vm3033_vm9 = vcmask 1046534   ;;  %vm3036_vm10 = vcmask 1047559  }
  0x1f   :  { %3916 = vmatprep.subr.mxu1 %v210_v3  ;;  %3897 = vmatpush3.msra.mxu0 %v69_v2  ;;  %v57_v8 = vld [vmem:[#allocation2] sm:$0xff]  ;;  %v66_v11 = vld [vmem:[%s5726_s1 + $0x8] sm:$0xff]  ;;  %v63_v16 = vld [vmem:[#allocation2 + $0x30] sm:$0xff]  ;;  %s4343_s15 = smov 64   ;;  %s4344_s16 = smov 32   ;;  %vm3556_vm11 = vcmask 523264  }
  0x20   :  { %3917 = vmatpush3.msra.mxu1 %v210_v3  ;;  %3898 = vmatprep.subr.mxu0 %v68_v4  ;;  %v65_v9 = vld [vmem:[%s5726_s1] sm:$0xff]  ;;  %v62_v15 = vld [vmem:[#allocation2 + $0x28] sm:$0xff]  ;;  %v64_v17 = vld [vmem:[#allocation2 + $0x38] sm:$0xff]  ;;  %vm3561_vm12 = vcmask 785408  }
  0x21   :  { %3918 = vmatprep.subr.mxu1 %v209_v5  ;;  %3899 = vmatpush3.msra.mxu0 %v68_v4  ;;  %v61_v14 = vld [vmem:[#allocation2 + $0x20] sm:$0xff] }
  0x22   :  { %3919 = vmatpush3.msra.mxu1 %v209_v5  ;;  %3900 = vmatprep.subr.mxu0 %v67_v6  ;;  %v3653_v18 = vld [vmem:[%s5728_s3] ss:$0 sm:$0xff]  ;;  %s4341_s3 = smov 112  }
  0x23   :  { %3920 = vmatprep.subr.mxu1 %v208_v7  ;;  %3901 = vmatpush3.msra.mxu0 %v67_v6  ;;  %v3662_v19 = vld [vmem:[%s5730_s5] ss:$0 sm:$0xff] }
  0x24   :  { %3902 = vmatprep.mubr.msk.f32.mxu0 %vm78_vm0, %v57_v8  ;;  %3921 = vmatpush3.msra.mxu1 %v208_v7 }
  0x25   :  { %3922 = vmatprep.mubr.msk.f32.mxu1 %vm78_vm0, %v65_v9  ;;  %3903 = vmatmul.mubr.msk.f32.vlgmr.msra.gmra.mxu0 %vm78_vm0, %v58_v10 }
  0x26   :  { %3923 = vmatmul.mubr.msk.f32.vlgmr.msra.gmra.mxu1 %vm78_vm0, %v66_v11  ;;  %3905 = vmatprep.mubr.msk.f32.mxu0 %vm78_vm0, %v59_v12 }
  0x29   :  { %3906 = vmatmul.mubr.msk.f32.gmra.mxu0 %vm78_vm0, %v60_v13 }
  0x2a   :  { %3908 = vmatprep.mubr.msk.f32.mxu0 %vm78_vm0, %v61_v14 }
  0x2d   :  { %3909 = vmatmul.mubr.msk.f32.gmra.mxu0 %vm78_vm0, %v62_v15 }
  0x2e   :  { %3911 = vmatprep.mubr.msk.f32.mxu0 %vm78_vm0, %v63_v16 }
  0x31   :  { %3912 = vmatmul.mubr.msk.f32.gmra.mxu0 %vm78_vm0, %v64_v17 }
  0xe5   :  { %v3904_v20 = vpop.f32.mrf.mxu0 }
  0xe6   :  { %v3924_v21 = vpop.f32.mrf.mxu1  ;;  %v175_v22 = vadd.f32 %v3904_v20, %v3653_v18 }
  0xe7   :  { %v4442_v23 = vadd.f32 %v3924_v21, %v3662_v19  ;;  %v169_v24 = vpop.f32.mrf.mxu0 }
  0xe8   :  { %v291_v25 = vpop.f32.mrf.mxu1  ;;  %v170_v27 = vadd.f32 %v3653_v18, %v169_v24  ;;  %v301_v29 = vmul.f32 %v175_v22, %v175_v22 }
  0xe9   :  { %v336_v26 = vmul.f32 %v4442_v23, %v4442_v23  ;;  %v4446_v28 = vadd.f32 %v3662_v19, %v291_v25  ;;  %v3907_v30 = vpop.f32.mrf.mxu0 }
  0xea   :  { %v300_v32 = vmul.f32 %v170_v27, %v170_v27  ;;  %v185_v34 = vadd.f32 %v3907_v30, %v3653_v18  ;;  %v310_v40 = vsel %vm308_vm1, %v301_v29, 0.0 }
  0xeb   :  { %v338_v31 = vmul.f32 4.0, %v336_v26  ;;  %v335_v33 = vmul.f32 %v4446_v28, %v4446_v28  ;;  %v179_v35 = vpop.f32.mrf.mxu0 }
  0xec   :  { %v309_v37 = vsel %vm308_vm1, %v300_v32, 0.0  ;;  %v180_v39 = vadd.f32 %v3653_v18, %v179_v35  ;;  %v303_v43 = vmul.f32 %v185_v34, %v185_v34 }
  0xed   :  { %v340_v36 = vmax.f32 %v338_v31, 1e-24  ;;  %v337_v38 = vmul.f32 4.0, %v335_v33  ;;  %v3910_v41 = vpop.f32.mrf.mxu0  ;;  %v311_v46 = vadd.f32 %v310_v40, %v309_v37 }
  0xee   :  { %v302_v44 = vmul.f32 %v180_v39, %v180_v39  ;;  %v195_v45 = vadd.f32 %v3910_v41, %v3653_v18  ;;  %v314_v53 = vsel %vm308_vm1, %v303_v43, 0.0 }
  0xef   :  { %v339_v42 = vmax.f32 %v337_v38, 1e-24  ;;  %4113 = vrsqrt.f32 %v340_v36  ;;  %v189_v47 = vpop.f32.mrf.mxu0 }
  0xf0   :  { %v312_v48 = vsel %vm308_vm1, %v302_v44, 0.0  ;;  %v305_v49 = vmul.f32 %v195_v45, %v195_v45  ;;  %v190_v50 = vadd.f32 %v3653_v18, %v189_v47 }
  0xf1   :  { %4115 = vrsqrt.f32 %v339_v42  ;;  %v313_v51 = vadd.f32 %v312_v48, %v311_v46  ;;  %v3913_v52 = vpop.f32.mrf.mxu0 }
  0xf2   :  { %v304_v54 = vmul.f32 %v190_v50, %v190_v50  ;;  %v205_v55 = vadd.f32 %v3913_v52, %v3653_v18  ;;  %v317_v58 = vsel %vm308_vm1, %v305_v49, 0.0 }
  0xf3   :  { %v315_v56 = vadd.f32 %v314_v53, %v313_v51  ;;  %v199_v57 = vpop.f32.mrf.mxu0 }
  0xf4   :  { %v316_v59 = vsel %vm308_vm1, %v304_v54, 0.0  ;;  %v200_v60 = vadd.f32 %v3653_v18, %v199_v57  ;;  %v307_v62 = vmul.f32 %v205_v55, %v205_v55 }
  0xf5   :  { %v323_v61 = vmax.f32 %v315_v56, 1e-24  ;;  %v318_v0 = vadd.f32 %v317_v58, %v316_v59 }
  0xf6   :  { %v306_v63 = vmul.f32 %v200_v60, %v200_v60  ;;  %v321_v3 = vsel %vm308_vm1, %v307_v62, 0.0 }
  0xf7   :  { %4117 = vrsqrt.f32 %v323_v61 }
  0xf8   :  { %v319_v1 = vsel %vm308_vm1, %v306_v63, 0.0 }
  0xf9   :  { %v320_v2 = vadd.f32 %v319_v1, %v318_v0 }
  0xfb   :  { %v322_v4 = vadd.f32 %v321_v3, %v320_v2 }
  0xfc   :  { %v4114_v5 = vpop.eup %4113 }
  0xfd   :  { %v324_v7 = vmax.f32 %v322_v4, 1e-24  ;;  %v344_v9 = vmul.f32 %v4114_v5, %v4442_v23 }
  0xfe   :  { %v4116_v6 = vpop.eup %4115 }
  0xff   :  { %v343_v8 = vmul.f32 %v4116_v6, %v4446_v28  ;;  %4119 = vrsqrt.f32 %v324_v7 }
 0x101   :  { %3925 = vmatprep.subr.msk.mxu1 %vm308_vm1, %v343_v8 }
 0x102   :  { %3926 = vmatpush3.xpose.msk.msra.mxu1 %vm308_vm1, %v343_v8 }
 0x103   :  { %3933 = vmatprep.subr.msk.mxu1 %vm308_vm1, %v344_v9 }
 0x104   :  { %v4118_v10 = vpop.eup %4117 }
 0x105   :  { %v327_v11 = vmul.f32 %v4118_v10, %v170_v27  ;;  %v328_v12 = vmul.f32 %v4118_v10, %v175_v22  ;;  %v329_v13 = vmul.f32 %v4118_v10, %v180_v39  ;;  %v330_v14 = vmul.f32 %v4118_v10, %v185_v34 }
 0x107   :  { %3927 = vmatprep.mubr.msk.f32.mxu1 %vm308_vm1, %v327_v11 }
 0x108   :  { %3928 = vmatmul.mubr.msk.f32.vlgmr.msra.gmra.mxu1 %vm308_vm1, %v328_v12 }
 0x109   :  { %3934 = vmatpush3.xpose.msk.msra.mxu1 %vm308_vm1, %v344_v9  ;;  %3930 = vmatprep.mubr.msk.f32.mxu1 %vm308_vm1, %v329_v13 }
 0x10c   :  { %v4120_v15 = vpop.eup %4119  ;;  %3931 = vmatmul.mubr.msk.f32.gmra.mxu1 %vm308_vm1, %v330_v14 }
 0x10d   :  { %v331_v16 = vmul.f32 %v4120_v15, %v190_v50  ;;  %v332_v17 = vmul.f32 %v4120_v15, %v195_v45  ;;  %v333_v18 = vmul.f32 %v4120_v15, %v200_v60  ;;  %v334_v19 = vmul.f32 %v4120_v15, %v205_v55 }
 0x10f   :  { %3935 = vmatprep.mubr.msk.f32.mxu1 %vm308_vm1, %v331_v16 }
 0x110   :  { %3936 = vmatmul.mubr.msk.f32.vlgmr.msra.gmra.mxu1 %vm308_vm1, %v332_v17 }
 0x111   :  { %3938 = vmatprep.mubr.msk.f32.mxu1 %vm308_vm1, %v333_v18 }
 0x114   :  { %3939 = vmatmul.mubr.msk.f32.gmra.mxu1 %vm308_vm1, %v334_v19 }
 0x1c8   :  { %v3929_v20 = vpop.f32.mrf.mxu1 }
 0x1c9   :  { %v546_v25 = vmul.f32 0.25, %v3929_v20 }
 0x1ca   :  { %v426_v21 = vpop.f32.mrf.mxu1 }
 0x1cb   :  { %v545_v22 = vmul.f32 0.25, %v426_v21  ;;  %v557_v32 = vsel %vm553_vm2, %v546_v25, -inf }
 0x1cc   :  { %v3932_v24 = vpop.f32.mrf.mxu1 }
 0x1cd   :  { %v554_v26 = vsel %vm553_vm2, %v545_v22, -inf  ;;  %v548_v31 = vmul.f32 0.25, %v3932_v24 }
 0x1ce   :  { %555 = vmax.xlane.f32.xlu0 %v554_v26  ;;  %v436_v27 = vpop.f32.mrf.mxu1 }
 0x1cf   :  { %v547_v29 = vmul.f32 0.25, %v436_v27  ;;  %v563_v38 = vsel %vm553_vm2, %v548_v31, -inf }
 0x1d0   :  { %v3937_v30 = vpop.f32.mrf.mxu1 }
 0x1d1   :  { %v560_v33 = vsel %vm553_vm2, %v547_v29, -inf  ;;  %v550_v37 = vmul.f32 0.25, %v3937_v30 }
 0x1d2   :  { %558 = vmax.xlane.f32.xlu0 %v557_v32  ;;  %561 = vmax.xlane.f32.xlu1 %v560_v33  ;;  %v526_v34 = vpop.f32.mrf.mxu1 }
 0x1d3   :  { %v549_v35 = vmul.f32 0.25, %v526_v34  ;;  %v569_v43 = vsel %vm553_vm2, %v550_v37, -inf }
 0x1d4   :  { %v3940_v36 = vpop.f32.mrf.mxu1 }
 0x1d5   :  { %v566_v39 = vsel %vm553_vm2, %v549_v35, -inf  ;;  %v552_v42 = vmul.f32 0.25, %v3940_v36 }
 0x1d6   :  { %564 = vmax.xlane.f32.xlu1 %v563_v38  ;;  %567 = vmax.xlane.f32.xlu0 %v566_v39  ;;  %v536_v40 = vpop.f32.mrf.mxu1  ;;  %v846_v39 = vld [vmem:[#allocation4 + $0x10] sm:$0xff] }
 0x1d7   :  { %v551_v41 = vmul.f32 0.25, %v536_v40  ;;  %v575_v45 = vsel %vm553_vm2, %v552_v42, -inf }
 0x1d9   :  { %v572_v44 = vsel %vm553_vm2, %v551_v41, -inf }
 0x1da   :  { %570 = vmax.xlane.f32.xlu1 %v569_v43  ;;  %573 = vmax.xlane.f32.xlu0 %v572_v44 }
 0x1de   :  { %576 = vmax.xlane.f32.xlu1 %v575_v45 }
 0x257   :  { %v556_v46 = vpop.xlane.xlu0 %555 }
 0x258   :  { %v578_v47 = vsub.f32 %v545_v22, %v556_v46 }
 0x25a   :  { %v586_v48 = vmul.f32 1.442695, %v578_v47 }
 0x25b   :  { %v559_v49 = vpop.xlane.xlu0 %558  ;;  %v562_v50 = vpop.xlane.xlu1 %561 }
 0x25c   :  { %4121 = vpow2.f32 %v586_v48  ;;  %v579_v51 = vsub.f32 %v546_v25, %v559_v49  ;;  %v580_v52 = vsub.f32 %v547_v29, %v562_v50  ;;  %v845_v50 = vld [vmem:[#allocation4 + $0x8] sm:$0xff] }
 0x25e   :  { %v588_v53 = vmul.f32 1.442695, %v579_v51  ;;  %v590_v54 = vmul.f32 1.442695, %v580_v52  ;;  %v844_v51 = vld [vmem:[#allocation4] sm:$0xff] }
 0x25f   :  { %v565_v55 = vpop.xlane.xlu1 %564  ;;  %v568_v56 = vpop.xlane.xlu0 %567 }
 0x260   :  { %4123 = vpow2.f32 %v588_v53  ;;  %v581_v57 = vsub.f32 %v548_v31, %v565_v55  ;;  %v582_v58 = vsub.f32 %v549_v35, %v568_v56 }
 0x261   :  { %4125 = vpow2.f32 %v590_v54 }
 0x262   :  { %v592_v59 = vmul.f32 1.442695, %v581_v57  ;;  %v594_v60 = vmul.f32 1.442695, %v582_v58 }
 0x263   :  { %v571_v61 = vpop.xlane.xlu1 %570  ;;  %v574_v62 = vpop.xlane.xlu0 %573 }
 0x264   :  { %4127 = vpow2.f32 %v592_v59  ;;  %v583_v63 = vsub.f32 %v550_v37, %v571_v61  ;;  %v584_v0 = vsub.f32 %v551_v41, %v574_v62 }
 0x265   :  { %4129 = vpow2.f32 %v594_v60  ;;  %v3683_v60 = vld [vmem:[%s5732_s7] ss:$0 sm:$0xff]  ;;  %s4342_s7 = smov 96  }
 0x266   :  { %v596_v1 = vmul.f32 1.442695, %v583_v63  ;;  %v598_v2 = vmul.f32 1.442695, %v584_v0 }
 0x267   :  { %v577_v3 = vpop.xlane.xlu1 %576 }
 0x268   :  { %4131 = vpow2.f32 %v596_v1  ;;  %v585_v4 = vsub.f32 %v552_v42, %v577_v3 }
 0x269   :  { %v4122_v5 = vpop.eup %4121  ;;  %4133 = vpow2.f32 %v598_v2 }
 0x26a   :  { %v600_v6 = vmul.f32 1.442695, %v585_v4  ;;  %v602_v7 = vsel %vm553_vm2, %v4122_v5, 0.0 }
 0x26b   :  { %603 = vadd.xlane.f32.xlu0 %v602_v7 }
 0x26c   :  { %4135 = vpow2.f32 %v600_v6 }
 0x26d   :  { %v4124_v8 = vpop.eup %4123 }
 0x26e   :  { %v4126_v9 = vpop.eup %4125  ;;  %v605_v10 = vsel %vm553_vm2, %v4124_v8, 0.0 }
 0x26f   :  { %606 = vadd.xlane.f32.xlu1 %v605_v10  ;;  %v608_v11 = vsel %vm553_vm2, %v4126_v9, 0.0 }
 0x270   :  { %609 = vadd.xlane.f32.xlu0 %v608_v11 }
 0x271   :  { %v4128_v12 = vpop.eup %4127 }
 0x272   :  { %v4130_v13 = vpop.eup %4129  ;;  %v611_v14 = vsel %vm553_vm2, %v4128_v12, 0.0 }
 0x273   :  { %612 = vadd.xlane.f32.xlu1 %v611_v14  ;;  %v614_v15 = vsel %vm553_vm2, %v4130_v13, 0.0 }
 0x274   :  { %615 = vadd.xlane.f32.xlu0 %v614_v15 }
 0x275   :  { %v4132_v16 = vpop.eup %4131 }
 0x276   :  { %v4134_v17 = vpop.eup %4133  ;;  %v617_v18 = vsel %vm553_vm2, %v4132_v16, 0.0 }
 0x277   :  { %618 = vadd.xlane.f32.xlu1 %v617_v18  ;;  %v620_v19 = vsel %vm553_vm2, %v4134_v17, 0.0 }
 0x278   :  { %621 = vadd.xlane.f32.xlu0 %v620_v19 }
 0x279   :  { %v4136_v20 = vpop.eup %4135 }
 0x27a   :  { %v623_v21 = vsel %vm553_vm2, %v4136_v20, 0.0 }
 0x27b   :  { %624 = vadd.xlane.f32.xlu1 %v623_v21 }
 0x28c   :  { %744 = vrot.lane.b32.xlu1 %v4442_v23, %s4341_s3 }
 0x28e   :  { %643 = vrot.lane.b32.xlu0 %v4446_v28, %s4341_s3  ;;  %v847_v28 = vld [vmem:[#allocation4 + $0x18] sm:$0xff] }
 0x2f4   :  { %v604_v22 = vpop.xlane.xlu0 %603 }
 0x2f5   :  { %4137 = vrcp.f32 %v604_v22 }
 0x2f8   :  { %v607_v24 = vpop.xlane.xlu1 %606 }
 0x2f9   :  { %4139 = vrcp.f32 %v607_v24  ;;  %v610_v25 = vpop.xlane.xlu0 %609 }
 0x2fa   :  { %4141 = vrcp.f32 %v610_v25 }
 0x2fc   :  { %v613_v26 = vpop.xlane.xlu1 %612 }
 0x2fd   :  { %4143 = vrcp.f32 %v613_v26  ;;  %v616_v27 = vpop.xlane.xlu0 %615 }
 0x2fe   :  { %4145 = vrcp.f32 %v616_v27 }
 0x300   :  { %v619_v29 = vpop.xlane.xlu1 %618 }
 0x301   :  { %4147 = vrcp.f32 %v619_v29  ;;  %v622_v30 = vpop.xlane.xlu0 %621 }
 0x302   :  { %v4138_v31 = vpop.eup %4137  ;;  %4149 = vrcp.f32 %v622_v30 }
 0x303   :  { %v627_v32 = vmul.f32 %v4138_v31, %v4122_v5 }
 0x304   :  { %v625_v23 = vpop.xlane.xlu1 %624 }
 0x305   :  { %4151 = vrcp.f32 %v625_v23  ;;  %v644_v33 = vpop.permute.xlu0 %643  ;;  %3943 = vmatprep.mubr.msk.f32.mxu0 %vm553_vm2, %v627_v32 }
 0x306   :  { %v4140_v34 = vpop.eup %4139  ;;  %3941 = vmatprep.subr.mxu0 %v644_v33 }
 0x307   :  { %v4142_v35 = vpop.eup %4141  ;;  %v629_v36 = vmul.f32 %v4140_v34, %v4124_v8  ;;  %3942 = vmatpush3.msra.mxu0 %v644_v33 }
 0x308   :  { %v745_v37 = vpop.permute.xlu1 %744  ;;  %v631_v38 = vmul.f32 %v4142_v35, %v4126_v9  ;;  %3957 = vmatprep.subr.mxu0 %v847_v28 }
 0x309   :  { %3944 = vmatmul.mubr.msk.f32.vlgmr.msra.gmra.mxu0 %vm553_vm2, %v629_v36  ;;  %3949 = vmatprep.subr.mxu1 %v745_v37 }
 0x30a   :  { %v4144_v40 = vpop.eup %4143  ;;  %3946 = vmatprep.mubr.msk.f32.mxu0 %vm553_vm2, %v631_v38  ;;  %3950 = vmatpush3.msra.mxu1 %v745_v37 }
 0x30b   :  { %v4146_v41 = vpop.eup %4145  ;;  %v633_v42 = vmul.f32 %v4144_v40, %v4128_v12  ;;  %3958 = vmatpush3.msra.mxu0 %v847_v28 }
 0x30c   :  { %v635_v43 = vmul.f32 %v4146_v41, %v4130_v13  ;;  %3959 = vmatprep.subr.mxu0 %v846_v39 }
 0x30d   :  { %3947 = vmatmul.mubr.msk.f32.gmra.mxu0 %vm553_vm2, %v633_v42 }
 0x30e   :  { %v4148_v44 = vpop.eup %4147  ;;  %3951 = vmatprep.mubr.msk.f32.mxu1 %vm553_vm2, %v635_v43  ;;  %3960 = vmatpush3.msra.mxu0 %v846_v39 }
 0x30f   :  { %v4150_v45 = vpop.eup %4149  ;;  %v637_v46 = vmul.f32 %v4148_v44, %v4132_v16  ;;  %3961 = vmatprep.subr.mxu0 %v845_v50 }
 0x310   :  { %v639_v47 = vmul.f32 %v4150_v45, %v4134_v17  ;;  %3962 = vmatpush3.msra.mxu0 %v845_v50 }
 0x311   :  { %3952 = vmatmul.mubr.msk.f32.vlgmr.msra.gmra.mxu1 %vm553_vm2, %v637_v46  ;;  %3963 = vmatprep.subr.mxu0 %v844_v51 }
 0x312   :  { %v4152_v48 = vpop.eup %4151  ;;  %3954 = vmatprep.mubr.msk.f32.mxu1 %vm553_vm2, %v639_v47  ;;  %3964 = vmatpush3.msra.mxu0 %v844_v51 }
 0x313   :  { %v641_v49 = vmul.f32 %v4152_v48, %v4136_v20 }
 0x315   :  { %3955 = vmatmul.mubr.msk.f32.gmra.mxu1 %vm553_vm2, %v641_v49 }
 0x3c9   :  { %v3945_v52 = vpop.f32.mrf.mxu0 }
 0x3cb   :  { %v724_v53 = vpop.f32.mrf.mxu0 }
 0x3cc   :  { %3965 = vmatprep.mubr.msk.f32.mxu0 %vm78_vm0, %v724_v53 }
 0x3cd   :  { %v3948_v54 = vpop.f32.mrf.mxu0  ;;  %3966 = vmatmul.mubr.msk.f32.vlgmr.msra.gmra.mxu0 %vm78_vm0, %v3945_v52 }
 0x3cf   :  { %v734_v55 = vpop.f32.mrf.mxu0 }
 0x3d0   :  { %3968 = vmatprep.mubr.msk.f32.mxu0 %vm78_vm0, %v734_v55 }
 0x3d1   :  { %v3953_v56 = vpop.f32.mrf.mxu1  ;;  %3969 = vmatmul.mubr.msk.f32.gmra.mxu0 %vm78_vm0, %v3948_v54 }
 0x3d3   :  { %v825_v57 = vpop.f32.mrf.mxu1 }
 0x3d4   :  { %3971 = vmatprep.mubr.msk.f32.mxu0 %vm78_vm0, %v825_v57 }
 0x3d5   :  { %v3956_v58 = vpop.f32.mrf.mxu1  ;;  %3972 = vmatmul.mubr.msk.f32.gmra.mxu0 %vm78_vm0, %v3953_v56 }
 0x3d7   :  { %v835_v59 = vpop.f32.mrf.mxu1 }
 0x3d8   :  { %3974 = vmatprep.mubr.msk.f32.mxu0 %vm78_vm0, %v835_v59 }
 0x3d9   :  { %3975 = vmatmul.mubr.msk.f32.gmra.mxu0 %vm78_vm0, %v3956_v58 }
 0x48d   :  { %v3967_v61 = vpop.f32.mrf.mxu0 }
 0x48e   :  { %v4511_v62 = vadd.f32 %v3967_v61, %v3683_v60 }
 0x48f   :  { %v945_v63 = vpop.f32.mrf.mxu0 }
 0x490   :  { %v4513_v0 = vadd.f32 %v3683_v60, %v945_v63  ;;  %v985_v1 = vmul.f32 %v4511_v62, %v4511_v62 }
 0x491   :  { %v3970_v2 = vpop.f32.mrf.mxu0 }
 0x492   :  { %v984_v3 = vmul.f32 %v4513_v0, %v4513_v0  ;;  %v4519_v4 = vadd.f32 %v3970_v2, %v3683_v60  ;;  %v993_v9 = vsel %vm308_vm1, %v985_v1, 0.0  ;;  %v1022_v11 = vsel %vm1020_vm3, %v985_v1, 0.0 }
 0x493   :  { %v955_v5 = vpop.f32.mrf.mxu0 }
 0x494   :  { %v992_v6 = vsel %vm308_vm1, %v984_v3, 0.0  ;;  %v1021_v7 = vsel %vm1020_vm3, %v984_v3, 0.0  ;;  %v4523_v8 = vadd.f32 %v3683_v60, %v955_v5  ;;  %v987_v12 = vmul.f32 %v4519_v4, %v4519_v4 }
 0x495   :  { %v3973_v10 = vpop.f32.mrf.mxu0  ;;  %v994_v15 = vadd.f32 %v993_v9, %v992_v6  ;;  %v1023_v16 = vadd.f32 %v1022_v11, %v1021_v7 }
 0x496   :  { %v986_v13 = vmul.f32 %v4523_v8, %v4523_v8  ;;  %v4531_v14 = vadd.f32 %v3973_v10, %v3683_v60  ;;  %v997_v26 = vsel %vm308_vm1, %v987_v12, 0.0  ;;  %v1026_v27 = vsel %vm1020_vm3, %v987_v12, 0.0 }
 0x497   :  { %v965_v17 = vpop.f32.mrf.mxu0 }
 0x498   :  { %v995_v18 = vsel %vm308_vm1, %v986_v13, 0.0  ;;  %v1024_v19 = vsel %vm1020_vm3, %v986_v13, 0.0  ;;  %v989_v20 = vmul.f32 %v4531_v14, %v4531_v14  ;;  %v4537_v21 = vadd.f32 %v3683_v60, %v965_v17 }
 0x499   :  { %v996_v22 = vadd.f32 %v995_v18, %v994_v15  ;;  %v1025_v24 = vadd.f32 %v1024_v19, %v1023_v16  ;;  %v3976_v25 = vpop.f32.mrf.mxu0 }
 0x49a   :  { %v988_v29 = vmul.f32 %v4537_v21, %v4537_v21  ;;  %v4543_v30 = vadd.f32 %v3976_v25, %v3683_v60  ;;  %v1000_v33 = vsel %vm308_vm1, %v989_v20, 0.0  ;;  %v1029_v39 = vsel %vm1020_vm3, %v989_v20, 0.0 }
 0x49b   :  { %v998_v31 = vadd.f32 %v997_v26, %v996_v22  ;;  %v1027_v32 = vadd.f32 %v1026_v27, %v1025_v24  ;;  %v975_v23 = vpop.f32.mrf.mxu0 }
 0x49c   :  { %v999_v28 = vsel %vm308_vm1, %v988_v29, 0.0  ;;  %v1028_v34 = vsel %vm1020_vm3, %v988_v29, 0.0  ;;  %v4548_v35 = vadd.f32 %v3683_v60, %v975_v23  ;;  %v991_v40 = vmul.f32 %v4543_v30, %v4543_v30 }
 0x49d   :  { %v1006_v36 = vmul.f32 4.0, %v998_v31  ;;  %v1035_v37 = vmul.f32 4.0, %v1027_v32  ;;  %v1001_v38 = vadd.f32 %v1000_v33, %v999_v28  ;;  %v1030_v44 = vadd.f32 %v1029_v39, %v1028_v34 }
 0x49e   :  { %v990_v41 = vmul.f32 %v4548_v35, %v4548_v35  ;;  %v1004_v49 = vsel %vm308_vm1, %v991_v40, 0.0  ;;  %v1033_v50 = vsel %vm1020_vm3, %v991_v40, 0.0 }
 0x49f   :  { %v1008_v42 = vmax.f32 %v1006_v36, 1e-24  ;;  %v1037_v43 = vmax.f32 %v1035_v37, 1e-24 }
 0x4a0   :  { %v1002_v45 = vsel %vm308_vm1, %v990_v41, 0.0  ;;  %v1031_v46 = vsel %vm1020_vm3, %v990_v41, 0.0 }
 0x4a1   :  { %4153 = vrsqrt.f32 %v1008_v42  ;;  %v1003_v47 = vadd.f32 %v1002_v45, %v1001_v38  ;;  %v1032_v48 = vadd.f32 %v1031_v46, %v1030_v44 }
 0x4a2   :  { %4155 = vrsqrt.f32 %v1037_v43 }
 0x4a3   :  { %v1005_v51 = vadd.f32 %v1004_v49, %v1003_v47  ;;  %v1034_v52 = vadd.f32 %v1033_v50, %v1032_v48 }
 0x4a5   :  { %v1036_v53 = vmul.f32 4.0, %v1034_v52  ;;  %v1007_v9 = vmul.f32 4.0, %v1005_v51 }
 0x4a7   :  { %v1038_v54 = vmax.f32 %v1036_v53, 1e-24  ;;  %v1009_v10 = vmax.f32 %v1007_v9, 1e-24 }
 0x4a9   :  { %4157 = vrsqrt.f32 %v1038_v54 }
 0x4aa   :  { %4159 = vrsqrt.f32 %v1009_v10 }
 0x4ae   :  { %v4154_v55 = vpop.eup %4153 }
 0x4af   :  { %v4156_v56 = vpop.eup %4155  ;;  %v4560_v57 = vmul.f32 %v4154_v55, %v4513_v0  ;;  %v4563_v58 = vmul.f32 %v4154_v55, %v4511_v62  ;;  %v4566_v59 = vmul.f32 %v4154_v55, %v4523_v8 }
 0x4b0   :  { %v1043_v60 = vmul.f32 %v4156_v56, %v4523_v8  ;;  %v1041_v61 = vmul.f32 %v4156_v56, %v4513_v0  ;;  %v1042_v63 = vmul.f32 %v4156_v56, %v4511_v62  ;;  %v1044_v3 = vmul.f32 %v4156_v56, %v4519_v4 }
 0x4b1   :  { %3979 = vmatprep.mubr.msk.f32.mxu1 %vm308_vm1, %v4560_v57  ;;  %3995 = vmatprep.mubr.msk.f32.mxu0 %vm308_vm1, %v4560_v57 }
 0x4b2   :  { %1242 = vrot.lane.b32.xlu0 %v1043_v60, %s4341_s3  ;;  %1050 = vrot.lane.b32.xlu1 %v1041_v61, %s4341_s3 }
 0x4b6   :  { %1152 = vrot.lane.b32.xlu1 %v1042_v63, %s4341_s3  ;;  %v4158_v1 = vpop.eup %4157 }
 0x4b7   :  { %v1045_v2 = vmul.f32 %v4158_v1, %v4537_v21  ;;  %v1047_v5 = vmul.f32 %v4158_v1, %v4548_v35  ;;  %v1046_v6 = vmul.f32 %v4158_v1, %v4531_v14  ;;  %v1048_v7 = vmul.f32 %v4158_v1, %v4543_v30 }
 0x4b9   :  { %1422 = vrot.lane.b32.xlu0 %v1045_v2, %s4341_s3 }
 0x4ba   :  { %1332 = vrot.lane.b32.xlu1 %v1044_v3, %s4341_s3 }
 0x4bd   :  { %1614 = vrot.lane.b32.xlu0 %v1047_v5, %s4341_s3 }
 0x4be   :  { %1524 = vrot.lane.b32.xlu1 %v1046_v6, %s4341_s3 }
 0x4c1   :  { %2178 = vrot.lane.b32.xlu0 %v4513_v0, %s4342_s7 }
 0x4c2   :  { %1704 = vrot.lane.b32.xlu1 %v1048_v7, %s4341_s3 }
 0x4c5   :  { %2380 = vrot.lane.b32.xlu0 %v4523_v8, %s4342_s7  ;;  %v1015_v8 = vmul.f32 %v4154_v55, %v4519_v4 }
 0x4c6   :  { %2279 = vrot.lane.b32.xlu1 %v4511_v62, %s4342_s7  ;;  %v4160_v62 = vpop.eup %4159 }
 0x4c7   :  { %v1016_v16 = vmul.f32 %v4160_v62, %v4537_v21  ;;  %v1017_v18 = vmul.f32 %v4160_v62, %v4531_v14  ;;  %v1018_v20 = vmul.f32 %v4160_v62, %v4548_v35  ;;  %v1019_v24 = vmul.f32 %v4160_v62, %v4543_v30 }
 0x524   :  { %v1243_v11 = vpop.permute.xlu0 %1242  ;;  %v1051_v12 = vpop.permute.xlu1 %1050 }
 0x525   :  { %3977 = vmatprep.subr.msk.mxu1 %vm308_vm1, %v1051_v12  ;;  %3993 = vmatprep.subr.msk.mxu0 %vm308_vm1, %v1243_v11 }
 0x526   :  { %3978 = vmatpush3.xpose.msk.msra.mxu1 %vm308_vm1, %v1051_v12  ;;  %3994 = vmatpush3.xpose.msk.msra.mxu0 %vm308_vm1, %v1243_v11 }
 0x528   :  { %v1153_v0 = vpop.permute.xlu1 %1152 }
 0x529   :  { %3980 = vmatmul.mubr.msk.f32.vlgmr.msra.gmra.mxu1 %vm308_vm1, %v4563_v58  ;;  %3985 = vmatprep.subr.msk.mxu1 %vm308_vm1, %v1153_v0 }
 0x52a   :  { %3996 = vmatmul.mubr.msk.f32.vlgmr.msra.gmra.mxu0 %vm308_vm1, %v4563_v58  ;;  %3982 = vmatprep.mubr.msk.f32.mxu1 %vm308_vm1, %v4566_v59 }
 0x52b   :  { %3986 = vmatpush3.xpose.msk.msra.mxu1 %vm308_vm1, %v1153_v0  ;;  %3998 = vmatprep.mubr.msk.f32.mxu0 %vm308_vm1, %v4566_v59  ;;  %v1423_v13 = vpop.permute.xlu0 %1422 }
 0x52c   :  { %v1333_v15 = vpop.permute.xlu1 %1332  ;;  %4009 = vmatprep.subr.msk.mxu0 %vm308_vm1, %v1423_v13 }
 0x52d   :  { %3983 = vmatmul.mubr.msk.f32.gmra.mxu1 %vm308_vm1, %v1015_v8  ;;  %4001 = vmatprep.subr.msk.mxu1 %vm308_vm1, %v1333_v15 }
 0x52e   :  { %3999 = vmatmul.mubr.msk.f32.gmra.mxu0 %vm308_vm1, %v1015_v8  ;;  %3987 = vmatprep.mubr.msk.f32.mxu1 %vm308_vm1, %v4560_v57 }
 0x52f   :  { %4010 = vmatpush3.xpose.msk.msra.mxu0 %vm308_vm1, %v1423_v13  ;;  %4011 = vmatprep.mubr.msk.f32.mxu0 %vm308_vm1, %v1016_v16  ;;  %v1615_v17 = vpop.permute.xlu0 %1614 }
 0x530   :  { %v1525_v19 = vpop.permute.xlu1 %1524  ;;  %4025 = vmatprep.subr.msk.mxu0 %vm308_vm1, %v1615_v17 }
 0x531   :  { %3988 = vmatmul.mubr.msk.f32.vlgmr.msra.gmra.mxu1 %vm308_vm1, %v4563_v58 }
 0x532   :  { %4002 = vmatpush3.xpose.msk.msra.mxu1 %vm308_vm1, %v1333_v15  ;;  %4012 = vmatmul.mubr.msk.f32.vlgmr.msra.gmra.mxu0 %vm308_vm1, %v1017_v18 }
 0x533   :  { %3990 = vmatprep.mubr.msk.f32.mxu1 %vm308_vm1, %v4566_v59  ;;  %4014 = vmatprep.mubr.msk.f32.mxu0 %vm308_vm1, %v1018_v20  ;;  %v2179_v22 = vpop.permute.xlu0 %2178 }
 0x534   :  { %4017 = vmatprep.subr.msk.mxu1 %vm308_vm1, %v1525_v19  ;;  %4026 = vmatpush3.xpose.msk.msra.mxu0 %vm308_vm1, %v1615_v17  ;;  %v1705_v26 = vpop.permute.xlu1 %1704 }
 0x535   :  { %3991 = vmatmul.mubr.msk.f32.gmra.mxu1 %vm308_vm1, %v1015_v8  ;;  %4041 = vmatprep.subr.mxu0 %v2179_v22 }
 0x536   :  { %4015 = vmatmul.mubr.msk.f32.gmra.mxu0 %vm308_vm1, %v1019_v24  ;;  %4003 = vmatprep.mubr.msk.f32.mxu1 %vm308_vm1, %v4560_v57 }
 0x537   :  { %4027 = vmatprep.mubr.msk.f32.mxu0 %vm308_vm1, %v1016_v16  ;;  %v4638_v25 = vpop.permute.xlu0 %2380 }
 0x538   :  { %v2280_v27 = vpop.permute.xlu1 %2279 }
 0x539   :  { %4004 = vmatmul.mubr.msk.f32.vlgmr.msra.gmra.mxu1 %vm308_vm1, %v4563_v58 }
 0x53a   :  { %4018 = vmatpush3.xpose.msk.msra.mxu1 %vm308_vm1, %v1525_v19  ;;  %4028 = vmatmul.mubr.msk.f32.vlgmr.msra.gmra.mxu0 %vm308_vm1, %v1017_v18 }
 0x53b   :  { %4042 = vmatpush3.msra.mxu0 %v2179_v22  ;;  %4006 = vmatprep.mubr.msk.f32.mxu1 %vm308_vm1, %v4566_v59 }
 0x53c   :  { %4030 = vmatprep.mubr.msk.f32.mxu0 %vm308_vm1, %v1018_v20  ;;  %4033 = vmatprep.subr.msk.mxu1 %vm308_vm1, %v1705_v26 }
 0x53d   :  { %4057 = vmatprep.subr.mxu0 %v4638_v25  ;;  %4007 = vmatmul.mubr.msk.f32.gmra.mxu1 %vm308_vm1, %v1015_v8 }
 0x53e   :  { %4031 = vmatmul.mubr.msk.f32.gmra.mxu0 %vm308_vm1, %v1019_v24  ;;  %4019 = vmatprep.mubr.msk.f32.mxu1 %vm308_vm1, %v1016_v16 }
 0x541   :  { %4020 = vmatmul.mubr.msk.f32.vlgmr.msra.gmra.mxu1 %vm308_vm1, %v1017_v18 }
 0x542   :  { %4034 = vmatpush3.xpose.msk.msra.mxu1 %vm308_vm1, %v1705_v26  ;;  %4022 = vmatprep.mubr.msk.f32.mxu1 %vm308_vm1, %v1018_v20 }
 0x543   :  { %4049 = vmatprep.subr.mxu1 %v2280_v27 }
 0x545   :  { %4023 = vmatmul.mubr.msk.f32.gmra.mxu1 %vm308_vm1, %v1019_v24 }
 0x546   :  { %4035 = vmatprep.mubr.msk.f32.mxu1 %vm308_vm1, %v1016_v16 }
 0x549   :  { %4036 = vmatmul.mubr.msk.f32.vlgmr.msra.gmra.mxu1 %vm308_vm1, %v1017_v18 }
 0x54a   :  { %4050 = vmatpush3.msra.mxu1 %v2280_v27  ;;  %4038 = vmatprep.mubr.msk.f32.mxu1 %vm308_vm1, %v1018_v20 }
 0x54d   :  { %4039 = vmatmul.mubr.msk.f32.gmra.mxu1 %vm308_vm1, %v1019_v24 }
 0x5e9   :  { %v3981_v29 = vpop.f32.mrf.mxu1 }
 0x5ea   :  { %v4658_v31 = vmul.f32 0.25, %v3981_v29  ;;  %v3997_v32 = vpop.f32.mrf.mxu0 }
 0x5eb   :  { %v1132_v23 = vpop.f32.mrf.mxu1  ;;  %v4660_v33 = vmul.f32 0.25, %v3997_v32 }
 0x5ec   :  { %v4662_v28 = vmul.f32 0.25, %v1132_v23  ;;  %v1312_v34 = vpop.f32.mrf.mxu0  ;;  %v1828_v36 = vsel %vm553_vm2, %v4658_v31, -inf }
 0x5ed   :  { %1829 = vmax.xlane.f32.xlu1 %v1828_v36  ;;  %v3984_v37 = vpop.f32.mrf.mxu1  ;;  %v4670_v42 = vmul.f32 0.25, %v1312_v34  ;;  %v1852_v44 = vsel %vm553_vm2, %v4660_v33, -inf }
 0x5ee   :  { %v4000_v38 = vpop.f32.mrf.mxu0  ;;  %v4666_v39 = vmul.f32 0.25, %v3984_v37  ;;  %v1825_v40 = vsel %vm553_vm2, %v4662_v28, -inf }
 0x5ef   :  { %1826 = vmax.xlane.f32.xlu0 %v1825_v40  ;;  %v1142_v41 = vpop.f32.mrf.mxu1  ;;  %v4674_v46 = vmul.f32 0.25, %v4000_v38  ;;  %v1849_v51 = vsel %vm553_vm2, %v4670_v42, -inf }
 0x5f0   :  { %v1322_v43 = vpop.f32.mrf.mxu0  ;;  %v1834_v48 = vsel %vm553_vm2, %v4666_v39, -inf  ;;  %v4682_v54 = vmul.f32 0.25, %v1142_v41 }
 0x5f1   :  { %1853 = vmax.xlane.f32.xlu1 %v1852_v44  ;;  %v3989_v45 = vpop.f32.mrf.mxu1  ;;  %v1858_v55 = vsel %vm553_vm2, %v4674_v46, -inf  ;;  %v4690_v61 = vmul.f32 0.25, %v1322_v43 }
 0x5f2   :  { %v4013_v47 = vpop.f32.mrf.mxu0  ;;  %v4678_v50 = vmul.f32 0.25, %v3989_v45  ;;  %v1831_v63 = vsel %vm553_vm2, %v4682_v54, -inf }
 0x5f3   :  { %1835 = vmax.xlane.f32.xlu0 %v1834_v48  ;;  %v1222_v49 = vpop.f32.mrf.mxu1  ;;  %v4686_v57 = vmul.f32 0.25, %v4013_v47  ;;  %v1855_v9 = vsel %vm553_vm2, %v4690_v61, -inf }
 0x5f4   :  { %v1504_v52 = vpop.f32.mrf.mxu0  ;;  %v1840_v58 = vsel %vm553_vm2, %v4678_v50, -inf  ;;  %v4698_v7 = vmul.f32 0.25, %v1222_v49 }
 0x5f5   :  { %1850 = vmax.xlane.f32.xlu1 %v1849_v51  ;;  %v3992_v53 = vpop.f32.mrf.mxu1  ;;  %v4694_v2 = vmul.f32 0.25, %v1504_v52  ;;  %v1876_v3 = vsel %vm553_vm2, %v4686_v57, -inf }
 0x5f6   :  { %v4016_v59 = vpop.f32.mrf.mxu0  ;;  %v4706_v62 = vmul.f32 0.25, %v3992_v53  ;;  %v1837_v8 = vsel %vm553_vm2, %v4698_v7, -inf }
 0x5f7   :  { %1859 = vmax.xlane.f32.xlu0 %v1858_v55  ;;  %v1232_v56 = vpop.f32.mrf.mxu1  ;;  %v1873_v11 = vsel %vm553_vm2, %v4694_v2, -inf  ;;  %v4714_v17 = vmul.f32 0.25, %v4016_v59 }
 0x5f8   :  { %v1514_v5 = vpop.f32.mrf.mxu0  ;;  %v1846_v18 = vsel %vm553_vm2, %v4706_v62, -inf  ;;  %v4722_v26 = vmul.f32 0.25, %v1232_v56 }
 0x5f9   :  { %1841 = vmax.xlane.f32.xlu1 %v1840_v58  ;;  %v4005_v60 = vpop.f32.mrf.mxu1  ;;  %v1882_v27 = vsel %vm553_vm2, %v4714_v17, -inf  ;;  %v4730_v34 = vmul.f32 0.25, %v1514_v5 }
 0x5fa   :  { %v4702_v10 = vmul.f32 0.25, %v4005_v60  ;;  %v4029_v12 = vpop.f32.mrf.mxu0  ;;  %v1843_v36 = vsel %vm553_vm2, %v4722_v26, -inf }
 0x5fb   :  { %1832 = vmax.xlane.f32.xlu0 %v1831_v63  ;;  %v1402_v1 = vpop.f32.mrf.mxu1  ;;  %v4710_v13 = vmul.f32 0.25, %v4029_v12  ;;  %v1879_v43 = vsel %vm553_vm2, %v4730_v34, -inf }
 0x5fc   :  { %v1864_v15 = vsel %vm553_vm2, %v4702_v10, -inf  ;;  %v4718_v19 = vmul.f32 0.25, %v1402_v1  ;;  %v1684_v22 = vpop.f32.mrf.mxu0 }
 0x5fd   :  { %1877 = vmax.xlane.f32.xlu1 %v1876_v3  ;;  %v4008_v6 = vpop.f32.mrf.mxu1  ;;  %v1900_v20 = vsel %vm553_vm2, %v4710_v13, -inf  ;;  %v4726_v29 = vmul.f32 0.25, %v1684_v22 }
 0x5fe   :  { %v1861_v32 = vsel %vm553_vm2, %v4718_v19, -inf  ;;  %v4738_v41 = vmul.f32 0.25, %v4008_v6  ;;  %v4032_v44 = vpop.f32.mrf.mxu0 }
 0x5ff   :  { %1856 = vmax.xlane.f32.xlu0 %v1855_v9  ;;  %v1412_v0 = vpop.f32.mrf.mxu1  ;;  %v1897_v38 = vsel %vm553_vm2, %v4726_v29, -inf  ;;  %v4746_v49 = vmul.f32 0.25, %v4032_v44 }
 0x600   :  { %v1870_v51 = vsel %vm553_vm2, %v4738_v41, -inf  ;;  %v4754_v56 = vmul.f32 0.25, %v1412_v0  ;;  %v1694_v59 = vpop.f32.mrf.mxu0 }
 0x601   :  { %1874 = vmax.xlane.f32.xlu1 %v1873_v11  ;;  %v4021_v16 = vpop.f32.mrf.mxu1  ;;  %v1906_v58 = vsel %vm553_vm2, %v4746_v49, -inf  ;;  %v4762_v3 = vmul.f32 0.25, %v1694_v59 }
 0x602   :  { %v4734_v37 = vmul.f32 0.25, %v4021_v16  ;;  %v1867_v5 = vsel %vm553_vm2, %v4754_v56, -inf }
 0x603   :  { %1838 = vmax.xlane.f32.xlu0 %v1837_v8  ;;  %v1594_v24 = vpop.f32.mrf.mxu1  ;;  %v1903_v12 = vsel %vm553_vm2, %v4762_v3, -inf }
 0x604   :  { %v4742_v45 = vmul.f32 0.25, %v1594_v24  ;;  %v1888_v47 = vsel %vm553_vm2, %v4734_v37, -inf }
 0x605   :  { %1865 = vmax.xlane.f32.xlu1 %v1864_v15  ;;  %v4024_v23 = vpop.f32.mrf.mxu1 }
 0x606   :  { %v1885_v53 = vsel %vm553_vm2, %v4742_v45, -inf  ;;  %v4770_v11 = vmul.f32 0.25, %v4024_v23 }
 0x607   :  { %1847 = vmax.xlane.f32.xlu0 %v1846_v18  ;;  %v1604_v40 = vpop.f32.mrf.mxu1 }
 0x608   :  { %v4776_v8 = vmul.f32 0.25, %v1604_v40  ;;  %v1894_v15 = vsel %vm553_vm2, %v4770_v11, -inf }
 0x609   :  { %1901 = vmax.xlane.f32.xlu1 %v1900_v20  ;;  %v4037_v48 = vpop.f32.mrf.mxu1 }
 0x60a   :  { %v4750_v52 = vmul.f32 0.25, %v4037_v48  ;;  %v1891_v16 = vsel %vm553_vm2, %v4776_v8, -inf }
 0x60b   :  { %1883 = vmax.xlane.f32.xlu0 %v1882_v27  ;;  %v1774_v55 = vpop.f32.mrf.mxu1 }
 0x60c   :  { %v4758_v60 = vmul.f32 0.25, %v1774_v55  ;;  %v1912_v63 = vsel %vm553_vm2, %v4750_v52, -inf }
 0x60d   :  { %1862 = vmax.xlane.f32.xlu1 %v1861_v32  ;;  %v4040_v1 = vpop.f32.mrf.mxu1 }
 0x60e   :  { %v4766_v6 = vmul.f32 0.25, %v4040_v1  ;;  %v1909_v9 = vsel %vm553_vm2, %v4758_v60, -inf }
 0x60f   :  { %1844 = vmax.xlane.f32.xlu0 %v1843_v36  ;;  %v1784_v18 = vpop.f32.mrf.mxu1 }
 0x610   :  { %v1918_v0 = vsel %vm553_vm2, %v4766_v6, -inf  ;;  %v4786_v20 = vmul.f32 0.25, %v1784_v18 }
 0x611   :  { %1898 = vmax.xlane.f32.xlu1 %v1897_v38 }
 0x612   :  { %v1915_v22 = vsel %vm553_vm2, %v4786_v20, -inf }
 0x613   :  { %1880 = vmax.xlane.f32.xlu0 %v1879_v43 }
 0x615   :  { %1889 = vmax.xlane.f32.xlu1 %v1888_v47 }
 0x617   :  { %1871 = vmax.xlane.f32.xlu0 %v1870_v51 }
 0x619   :  { %1886 = vmax.xlane.f32.xlu1 %v1885_v53 }
 0x61b   :  { %1907 = vmax.xlane.f32.xlu0 %v1906_v58 }
 0x61d   :  { %1913 = vmax.xlane.f32.xlu1 %v1912_v63 }
 0x61f   :  { %1868 = vmax.xlane.f32.xlu0 %v1867_v5 }
 0x621   :  { %1910 = vmax.xlane.f32.xlu1 %v1909_v9 }
 0x623   :  { %1904 = vmax.xlane.f32.xlu0 %v1903_v12 }
 0x625   :  { %1919 = vmax.xlane.f32.xlu1 %v1918_v0 }
 0x627   :  { %1895 = vmax.xlane.f32.xlu0 %v1894_v15 }
 0x62b   :  { %1892 = vmax.xlane.f32.xlu0 %v1891_v16 }
 0x636   :  { %2481 = vrot.lane.b32.xlu1 %v4519_v4, %s4342_s7 }
 0x641   :  { %2582 = vrot.lane.b32.xlu0 %v4537_v21, %s4342_s7 }
 0x660   :  { %1916 = vmax.xlane.f32.xlu0 %v1915_v22 }
 0x676   :  { %v1830_v24 = vpop.xlane.xlu1 %1829  ;;  %2683 = vrot.lane.b32.xlu0 %v4531_v14, %s4342_s7 }
 0x677   :  { %v1922_v27 = vsub.f32 %v4658_v31, %v1830_v24 }
 0x678   :  { %v1827_v32 = vpop.xlane.xlu0 %1826 }
 0x679   :  { %v1955_v23 = vmul.f32 1.442695, %v1922_v27  ;;  %v1921_v21 = vsub.f32 %v4662_v28, %v1827_v32 }
 0x67a   :  { %v1854_v36 = vpop.xlane.xlu1 %1853 }
 0x67b   :  { %4161 = vpow2.f32 %v1955_v23  ;;  %v1930_v4 = vsub.f32 %v4660_v33, %v1854_v36  ;;  %v1953_v47 = vmul.f32 1.442695, %v1921_v21 }
 0x67c   :  { %v1836_v38 = vpop.xlane.xlu0 %1835 }
 0x67d   :  { %v1971_v40 = vmul.f32 1.442695, %v1930_v4  ;;  %v1924_v48 = vsub.f32 %v4666_v39, %v1836_v38 }
 0x67e   :  { %v1851_v43 = vpop.xlane.xlu1 %1850 }
 0x67f   :  { %4163 = vpow2.f32 %v1971_v40  ;;  %v1929_v44 = vsub.f32 %v4670_v42, %v1851_v43  ;;  %v1959_v55 = vmul.f32 1.442695, %v1924_v48 }
 0x680   :  { %v1860_v14 = vpop.xlane.xlu0 %1859 }
 0x681   :  { %v1969_v51 = vmul.f32 1.442695, %v1929_v44  ;;  %v1932_v33 = vsub.f32 %v4674_v46, %v1860_v14 }
 0x682   :  { %v1842_v31 = vpop.xlane.xlu1 %1841 }
 0x683   :  { %4165 = vpow2.f32 %v1969_v51  ;;  %v1926_v53 = vsub.f32 %v4678_v50, %v1842_v31  ;;  %v1975_v39 = vmul.f32 1.442695, %v1932_v33 }
 0x684   :  { %4167 = vpow2.f32 %v1953_v47  ;;  %v1833_v28 = vpop.xlane.xlu0 %1832 }
 0x685   :  { %v1963_v58 = vmul.f32 1.442695, %v1926_v53  ;;  %v1923_v1 = vsub.f32 %v4682_v54, %v1833_v28 }
 0x686   :  { %v1878_v59 = vpop.xlane.xlu1 %1877 }
 0x687   :  { %4169 = vpow2.f32 %v1963_v58  ;;  %v1938_v63 = vsub.f32 %v4686_v57, %v1878_v59  ;;  %v1957_v57 = vmul.f32 1.442695, %v1923_v1 }
 0x688   :  { %v4800_v42 = vpop.eup %4161  ;;  %4171 = vpow2.f32 %v1959_v55  ;;  %v1857_v5 = vpop.xlane.xlu0 %1856 }
 0x689   :  { %v1987_v9 = vmul.f32 1.442695, %v1938_v63  ;;  %v2020_v50 = vsel %vm553_vm2, %v4800_v42, 0.0  ;;  %v1931_v15 = vsub.f32 %v4690_v61, %v1857_v5 }
 0x68a   :  { %v1875_v12 = vpop.xlane.xlu1 %1874  ;;  %2021 = vadd.xlane.f32.xlu1 %v2020_v50 }
 0x68b   :  { %4173 = vpow2.f32 %v1987_v9  ;;  %v1937_v46 = vsub.f32 %v4694_v2, %v1875_v12  ;;  %v1973_v2 = vmul.f32 1.442695, %v1931_v15 }
 0x68c   :  { %v4806_v0 = vpop.eup %4163  ;;  %4175 = vpow2.f32 %v1975_v39  ;;  %v1839_v16 = vpop.xlane.xlu0 %1838 }
 0x68d   :  { %v1925_v18 = vsub.f32 %v4698_v7, %v1839_v16  ;;  %v2044_v54 = vsel %vm553_vm2, %v4806_v0, 0.0  ;;  %v1985_v24 = vmul.f32 1.442695, %v1937_v46  ;;  %4177 = vpow2.f32 %v1957_v57 }
 0x68e   :  { %v1866_v22 = vpop.xlane.xlu1 %1865  ;;  %2045 = vadd.xlane.f32.xlu1 %v2044_v54 }
 0x68f   :  { %v1961_v27 = vmul.f32 1.442695, %v1925_v18  ;;  %v1934_v32 = vsub.f32 %v4702_v10, %v1866_v22 }
 0x690   :  { %v4813_v23 = vpop.eup %4165  ;;  %v1848_v36 = vpop.xlane.xlu0 %1847 }
 0x691   :  { %v4815_v4 = vpop.eup %4167  ;;  %4179 = vpow2.f32 %v1961_v27  ;;  %v1928_v61 = vsub.f32 %v4706_v62, %v1848_v36  ;;  %v2041_v7 = vsel %vm553_vm2, %v4813_v23, 0.0  ;;  %v1979_v38 = vmul.f32 1.442695, %v1934_v32 }
 0x692   :  { %v1902_v21 = vpop.xlane.xlu1 %1901  ;;  %2042 = vadd.xlane.f32.xlu1 %v2041_v7  ;;  %4181 = vpow2.f32 %v1985_v24  ;;  %v2017_v47 = vsel %vm553_vm2, %v4815_v4, 0.0 }
 0x693   :  { %v1946_v40 = vsub.f32 %v4710_v13, %v1902_v21  ;;  %4183 = vpow2.f32 %v1973_v2  ;;  %v1967_v43 = vmul.f32 1.442695, %v1928_v61 }
 0x694   :  { %v4821_v10 = vpop.eup %4169  ;;  %v1884_v44 = vpop.xlane.xlu0 %1883  ;;  %4185 = vpow2.f32 %v1979_v38 }
 0x695   :  { %v4825_v48 = vpop.eup %4171  ;;  %v1940_v62 = vsub.f32 %v4714_v17, %v1884_v44  ;;  %2018 = vadd.xlane.f32.xlu0 %v2017_v47  ;;  %v2032_v14 = vsel %vm553_vm2, %v4821_v10, 0.0  ;;  %v2003_v13 = vmul.f32 1.442695, %v1946_v40  ;;  %4187 = vpow2.f32 %v1967_v43 }
 0x696   :  { %v1863_v51 = vpop.xlane.xlu1 %1862  ;;  %2033 = vadd.xlane.f32.xlu1 %v2032_v14  ;;  %v2026_v28 = vsel %vm553_vm2, %v4825_v48, 0.0 }
 0x697   :  { %v1933_v31 = vsub.f32 %v4718_v19, %v1863_v51  ;;  %v1991_v55 = vmul.f32 1.442695, %v1940_v62  ;;  %4189 = vpow2.f32 %v2003_v13 }
 0x698   :  { %v4831_v53 = vpop.eup %4173  ;;  %v1845_v33 = vpop.xlane.xlu0 %1844 }
 0x699   :  { %v4835_v58 = vpop.eup %4175  ;;  %v1927_v17 = vsub.f32 %v4722_v26, %v1845_v33  ;;  %2027 = vadd.xlane.f32.xlu0 %v2026_v28  ;;  %v2068_v59 = vsel %vm553_vm2, %v4831_v53, 0.0  ;;  %v1977_v19 = vmul.f32 1.442695, %v1933_v31  ;;  %4191 = vpow2.f32 %v1991_v55 }
 0x69a   :  { %v1899_v63 = vpop.xlane.xlu1 %1898  ;;  %2069 = vadd.xlane.f32.xlu1 %v2068_v59  ;;  %v2050_v9 = vsel %vm553_vm2, %v4835_v58, 0.0  ;;  %v4843_v50 = vpop.eup %4177 }
 0x69b   :  { %v1945_v39 = vsub.f32 %v4726_v29, %v1899_v63  ;;  %v1965_v1 = vmul.f32 1.442695, %v1927_v17  ;;  %4193 = vpow2.f32 %v1977_v19  ;;  %v2023_v54 = vsel %vm553_vm2, %v4843_v50, 0.0 }
 0x69c   :  { %v1881_v5 = vpop.xlane.xlu0 %1880 }
 0x69d   :  { %v1939_v26 = vsub.f32 %v4730_v34, %v1881_v5  ;;  %2051 = vadd.xlane.f32.xlu0 %v2050_v9  ;;  %v2001_v57 = vmul.f32 1.442695, %v1945_v39  ;;  %4195 = vpow2.f32 %v1965_v1 }
 0x69e   :  { %v4846_v12 = vpop.eup %4179  ;;  %v1890_v46 = vpop.xlane.xlu1 %1889 }
 0x69f   :  { %v2029_v15 = vsel %vm553_vm2, %v4846_v12, 0.0  ;;  %v4850_v29 = vpop.eup %4181  ;;  %v1989_v16 = vmul.f32 1.442695, %v1939_v26  ;;  %4197 = vpow2.f32 %v2001_v57  ;;  %v1942_v51 = vsub.f32 %v4734_v37, %v1890_v46 }
 0x6a0   :  { %v1872_v18 = vpop.xlane.xlu0 %1871  ;;  %2030 = vadd.xlane.f32.xlu1 %v2029_v15  ;;  %v4854_v22 = vpop.eup %4183  ;;  %v2065_v27 = vsel %vm553_vm2, %v4850_v29, 0.0 }
 0x6a1   :  { %v1936_v34 = vsub.f32 %v4738_v41, %v1872_v18  ;;  %2024 = vadd.xlane.f32.xlu0 %v2023_v54  ;;  %v4859_v32 = vpop.eup %4185  ;;  %4199 = vpow2.f32 %v1989_v16  ;;  %v2047_v61 = vsel %vm553_vm2, %v4854_v22, 0.0  ;;  %v1995_v63 = vmul.f32 1.442695, %v1942_v51 }
 0x6a2   :  { %v1887_v24 = vpop.xlane.xlu1 %1886  ;;  %v4863_v7 = vpop.eup %4187  ;;  %v2056_v40 = vsel %vm553_vm2, %v4859_v32, 0.0 }
 0x6a3   :  { %v1983_v2 = vmul.f32 1.442695, %v1936_v34  ;;  %v2038_v47 = vsel %vm553_vm2, %v4863_v7, 0.0  ;;  %v1941_v59 = vsub.f32 %v4742_v45, %v1887_v24 }
 0x6a4   :  { %v1908_v36 = vpop.xlane.xlu0 %1907  ;;  %2066 = vadd.xlane.f32.xlu1 %v2065_v27  ;;  %v4868_v43 = vpop.eup %4189 }
 0x6a5   :  { %v1948_v21 = vsub.f32 %v4746_v49, %v1908_v36  ;;  %2048 = vadd.xlane.f32.xlu0 %v2047_v61  ;;  %4201 = vpow2.f32 %v1983_v2  ;;  %v2092_v31 = vsel %vm553_vm2, %v4868_v43, 0.0  ;;  %v1993_v45 = vmul.f32 1.442695, %v1941_v59 }
 0x6a6   :  { %v1914_v41 = vpop.xlane.xlu1 %1913  ;;  %v4872_v62 = vpop.eup %4191 }
 0x6a7   :  { %v2007_v38 = vmul.f32 1.442695, %v1948_v21  ;;  %v2074_v28 = vsel %vm553_vm2, %v4872_v62, 0.0  ;;  %v1950_v57 = vsub.f32 %v4750_v52, %v1914_v41 }
 0x6a8   :  { %v1869_v44 = vpop.xlane.xlu0 %1868  ;;  %2057 = vadd.xlane.f32.xlu1 %v2056_v40  ;;  %v4878_v55 = vpop.eup %4193 }
 0x6a9   :  { %4203 = vpow2.f32 %v2007_v38  ;;  %v1935_v14 = vsub.f32 %v4754_v56, %v1869_v44  ;;  %2039 = vadd.xlane.f32.xlu0 %v2038_v47  ;;  %v2053_v39 = vsel %vm553_vm2, %v4878_v55, 0.0  ;;  %v2011_v52 = vmul.f32 1.442695, %v1950_v57 }
 0x6aa   :  { %v1911_v49 = vpop.xlane.xlu1 %1910  ;;  %v4882_v17 = vpop.eup %4195 }
 0x6ab   :  { %v1981_v13 = vmul.f32 1.442695, %v1935_v14  ;;  %v2035_v9 = vsel %vm553_vm2, %v4882_v17, 0.0  ;;  %v1949_v27 = vsub.f32 %v4758_v60, %v1911_v49 }
 0x6ac   :  { %v1905_v33 = vpop.xlane.xlu0 %1904  ;;  %2093 = vadd.xlane.f32.xlu1 %v2092_v31  ;;  %v4888_v1 = vpop.eup %4197 }
 0x6ad   :  { %4205 = vpow2.f32 %v1981_v13  ;;  %v1947_v56 = vsub.f32 %v4762_v3, %v1905_v33  ;;  %2075 = vadd.xlane.f32.xlu0 %v2074_v28  ;;  %v2089_v16 = vsel %vm553_vm2, %v4888_v1, 0.0 }
 0x6ae   :  { %v1920_v37 = vpop.xlane.xlu1 %1919  ;;  %v4892_v26 = vpop.eup %4199 }
 0x6af   :  { %v2005_v19 = vmul.f32 1.442695, %v1947_v56  ;;  %v2071_v54 = vsel %vm553_vm2, %v4892_v26, 0.0  ;;  %v1952_v41 = vsub.f32 %v4766_v6, %v1920_v37 }
 0x6b0   :  { %v1896_v5 = vpop.xlane.xlu0 %1895  ;;  %2054 = vadd.xlane.f32.xlu1 %v2053_v39 }
 0x6b1   :  { %4207 = vpow2.f32 %v2005_v19  ;;  %v1944_v3 = vsub.f32 %v4770_v11, %v1896_v5  ;;  %2036 = vadd.xlane.f32.xlu0 %v2035_v9  ;;  %v2015_v40 = vmul.f32 1.442695, %v1952_v41 }
 0x6b2   :  { %v4895_v46 = vpop.permute.xlu1 %2481  ;;  %4209 = vpow2.f32 %v1995_v63  ;;  %v4903_v34 = vpop.eup %4201 }
 0x6b3   :  { %v1999_v15 = vmul.f32 1.442695, %v1944_v3  ;;  %4065 = vmatprep.subr.mxu1 %v4895_v46  ;;  %v2062_v61 = vsel %vm553_vm2, %v4903_v34, 0.0 }
 0x6b4   :  { %v1893_v18 = vpop.xlane.xlu0 %1892  ;;  %2090 = vadd.xlane.f32.xlu1 %v2089_v16 }
 0x6b5   :  { %4211 = vpow2.f32 %v1999_v15  ;;  %v1943_v11 = vsub.f32 %v4776_v8, %v1893_v18  ;;  %2072 = vadd.xlane.f32.xlu0 %v2071_v54  ;;  %v2009_v8 = vmul.f32 1.442695, %v1949_v27 }
 0x6b6   :  { %v4906_v24 = vpop.eup %4203  ;;  %4213 = vpow2.f32 %v1993_v45 }
 0x6b7   :  { %v1997_v2 = vmul.f32 1.442695, %v1943_v11  ;;  %v2098_v36 = vsel %vm553_vm2, %v4906_v24, 0.0 }
 0x6b8   :  { %2099 = vadd.xlane.f32.xlu1 %v2098_v36  ;;  %v4950_v39 = vpop.permute.xlu0 %2582 }
 0x6b9   :  { %4215 = vpow2.f32 %v1997_v2  ;;  %2063 = vadd.xlane.f32.xlu0 %v2062_v61 }
 0x6ba   :  { %v4913_v21 = vpop.eup %4205  ;;  %4217 = vpow2.f32 %v2011_v52 }
 0x6bb   :  { %v2059_v38 = vsel %vm553_vm2, %v4913_v21, 0.0  ;;  %4219 = vpow2.f32 %v2009_v8 }
 0x6bc   :  { %4221 = vpow2.f32 %v2015_v40 }
 0x6bd   :  { %2060 = vadd.xlane.f32.xlu0 %v2059_v38 }
 0x6be   :  { %v4918_v60 = vpop.eup %4207 }
 0x6bf   :  { %v2095_v44 = vsel %vm553_vm2, %v4918_v60, 0.0  ;;  %v4922_v47 = vpop.eup %4209 }
 0x6c0   :  { %2096 = vadd.xlane.f32.xlu1 %v2095_v44  ;;  %v2080_v6 = vsel %vm553_vm2, %v4922_v47, 0.0 }
 0x6c2   :  { %v4924_v14 = vpop.eup %4211 }
 0x6c3   :  { %v4926_v49 = vpop.eup %4213  ;;  %v2086_v51 = vsel %vm553_vm2, %v4924_v14, 0.0 }
 0x6c4   :  { %2081 = vadd.xlane.f32.xlu1 %v2080_v6  ;;  %2087 = vadd.xlane.f32.xlu0 %v2086_v51  ;;  %v2077_v31 = vsel %vm553_vm2, %v4926_v49, 0.0 }
 0x6c6   :  { %v4932_v13 = vpop.eup %4215 }
 0x6c7   :  { %v2083_v33 = vsel %vm553_vm2, %v4932_v13, 0.0  ;;  %v4938_v28 = vpop.eup %4217 }
 0x6c8   :  { %2078 = vadd.xlane.f32.xlu1 %v2077_v31  ;;  %2084 = vadd.xlane.f32.xlu0 %v2083_v33  ;;  %v2104_v56 = vsel %vm553_vm2, %v4938_v28, 0.0  ;;  %v4942_v59 = vpop.eup %4219 }
 0x6c9   :  { %v2101_v37 = vsel %vm553_vm2, %v4942_v59, 0.0  ;;  %v4946_v63 = vpop.eup %4221 }
 0x6ca   :  { %v2110_v19 = vsel %vm553_vm2, %v4946_v63, 0.0 }
 0x6cc   :  { %2105 = vadd.xlane.f32.xlu1 %v2104_v56 }
 0x6d0   :  { %2102 = vadd.xlane.f32.xlu1 %v2101_v37 }
 0x6d4   :  { %2111 = vadd.xlane.f32.xlu1 %v2110_v19 }
 0x6e5   :  { %2885 = vrot.lane.b32.xlu1 %v4543_v30, %s4342_s7 }
 0x6e9   :  { %v1917_v5 = vpop.xlane.xlu0 %1916 }
 0x6ea   :  { %v1951_v9 = vsub.f32 %v4786_v20, %v1917_v5 }
 0x6ec   :  { %v2013_v3 = vmul.f32 1.442695, %v1951_v9 }
 0x6ed   :  { %v4961_v18 = vpop.permute.xlu0 %2683 }
 0x6ee   :  { %4223 = vpow2.f32 %v2013_v3 }
 0x6fb   :  { %v4955_v45 = vpop.eup %4223 }
 0x6fc   :  { %v2107_v57 = vsel %vm553_vm2, %v4955_v45, 0.0 }
 0x6fd   :  { %2108 = vadd.xlane.f32.xlu0 %v2107_v57 }
 0x713   :  { %v2022_v15 = vpop.xlane.xlu1 %2021  ;;  %2784 = vrot.lane.b32.xlu0 %v4548_v35, %s4342_s7 }
 0x714   :  { %4225 = vrcp.f32 %v2022_v15 }
 0x717   :  { %v2046_v16 = vpop.xlane.xlu1 %2045 }
 0x71b   :  { %v2043_v54 = vpop.xlane.xlu1 %2042 }
 0x71e   :  { %v2019_v30 = vpop.xlane.xlu0 %2018 }
 0x71f   :  { %4227 = vrcp.f32 %v2019_v30  ;;  %v2034_v20 = vpop.xlane.xlu1 %2033 }
 0x720   :  { %4229 = vrcp.f32 %v2043_v54 }
 0x721   :  { %4231 = vrcp.f32 %v2034_v20  ;;  %v4226_v61 = vpop.eup %4225 }
 0x722   :  { %v2028_v11 = vpop.xlane.xlu0 %2027  ;;  %v2116_v38 = vmul.f32 %v4226_v61, %v4800_v42 }
 0x723   :  { %v2070_v52 = vpop.xlane.xlu1 %2069  ;;  %4233 = vrcp.f32 %v2028_v11 }
 0x726   :  { %v2052_v27 = vpop.xlane.xlu0 %2051 }
 0x729   :  { %v2031_v2 = vpop.xlane.xlu1 %2030 }
 0x72a   :  { %4235 = vrcp.f32 %v2031_v2  ;;  %v2025_v36 = vpop.xlane.xlu0 %2024 }
 0x72b   :  { %4237 = vrcp.f32 %v2025_v36 }
 0x72c   :  { %v4228_v35 = vpop.eup %4227  ;;  %4239 = vrcp.f32 %v2046_v16 }
 0x72d   :  { %v2067_v8 = vpop.xlane.xlu1 %2066  ;;  %v2114_v41 = vmul.f32 %v4228_v35, %v4815_v4  ;;  %v4230_v51 = vpop.eup %4229 }
 0x72e   :  { %v2049_v40 = vpop.xlane.xlu0 %2048  ;;  %v4232_v31 = vpop.eup %4231 }
 0x72f   :  { %4241 = vrcp.f32 %v2049_v40  ;;  %4043 = vmatprep.mubr.msk.f32.mxu0 %vm553_vm2, %v2114_v41  ;;  %v2124_v5 = vmul.f32 %v4232_v31, %v4821_v10 }
 0x730   :  { %4044 = vmatmul.mubr.msk.f32.vlgmr.msra.gmra.mxu0 %vm553_vm2, %v2116_v38  ;;  %4243 = vrcp.f32 %v2052_v27  ;;  %v4234_v42 = vpop.eup %4233 }
 0x731   :  { %4058 = vmatpush3.msra.mxu0 %v4638_v25  ;;  %v2058_v44 = vpop.xlane.xlu1 %2057  ;;  %4245 = vrcp.f32 %v2067_v8  ;;  %v2120_v57 = vmul.f32 %v4234_v42, %v4825_v48 }
 0x732   :  { %4073 = vmatprep.subr.mxu0 %v4950_v39  ;;  %v2040_v6 = vpop.xlane.xlu0 %2039  ;;  %4247 = vrcp.f32 %v2070_v52 }
 0x733   :  { %4249 = vrcp.f32 %v2040_v6 }
 0x735   :  { %v4969_v4 = vpop.xlane.xlu1 %2093 }
 0x736   :  { %v2076_v33 = vpop.xlane.xlu0 %2075 }
 0x737   :  { %v4236_v56 = vpop.eup %4235 }
 0x738   :  { %v4238_v37 = vpop.eup %4237  ;;  %v2122_v19 = vmul.f32 %v4236_v56, %v4846_v12  ;;  %v2130_v12 = vmul.f32 %v4230_v51, %v4813_v23 }
 0x739   :  { %v2055_v25 = vpop.xlane.xlu1 %2054  ;;  %v2118_v9 = vmul.f32 %v4238_v37, %v4843_v50  ;;  %v4240_v15 = vpop.eup %4239 }
 0x73a   :  { %4251 = vrcp.f32 %v2055_v25  ;;  %4051 = vmatprep.mubr.msk.f32.mxu1 %vm553_vm2, %v2122_v19  ;;  %v2037_v3 = vpop.xlane.xlu0 %2036  ;;  %v2132_v48 = vmul.f32 %v4240_v15, %v4806_v0 }
 0x73b   :  { %4253 = vrcp.f32 %v2037_v3  ;;  %4046 = vmatprep.mubr.msk.f32.mxu0 %vm553_vm2, %v2118_v9  ;;  %4052 = vmatmul.mubr.msk.f32.vlgmr.msra.gmra.mxu1 %vm553_vm2, %v2124_v5 }
 0x73c   :  { %v4242_v16 = vpop.eup %4241  ;;  %4255 = vrcp.f32 %v2058_v44  ;;  %4066 = vmatpush3.msra.mxu1 %v4895_v46  ;;  %4047 = vmatmul.mubr.msk.f32.gmra.mxu0 %vm553_vm2, %v2120_v57 }
 0x73d   :  { %4257 = vrcp.f32 %v2076_v33  ;;  %4081 = vmatprep.subr.mxu1 %v4961_v18  ;;  %v2091_v10 = vpop.xlane.xlu1 %2090  ;;  %4059 = vmatprep.mubr.msk.f32.mxu0 %vm553_vm2, %v2130_v12  ;;  %v4244_v54 = vpop.eup %4243  ;;  %v2134_v23 = vmul.f32 %v4242_v16, %v4854_v22 }
 0x73e   :  { %4259 = vrcp.f32 %v2091_v10  ;;  %v2073_v50 = vpop.xlane.xlu0 %2072  ;;  %v4246_v30 = vpop.eup %4245  ;;  %v2136_v20 = vmul.f32 %v4244_v54, %v4835_v58 }
 0x73f   :  { %4261 = vrcp.f32 %v2073_v50  ;;  %v4248_v11 = vpop.eup %4247  ;;  %v2146_v52 = vmul.f32 %v4246_v30, %v4850_v29 }
 0x740   :  { %4060 = vmatmul.mubr.msk.f32.vlgmr.msra.gmra.mxu0 %vm553_vm2, %v2132_v48  ;;  %v4250_v22 = vpop.eup %4249  ;;  %v2148_v27 = vmul.f32 %v4248_v11, %v4831_v53 }
 0x741   :  { %4074 = vmatpush3.msra.mxu0 %v4950_v39  ;;  %4062 = vmatprep.mubr.msk.f32.mxu0 %vm553_vm2, %v2134_v23  ;;  %v4991_v0 = vpop.xlane.xlu1 %2099  ;;  %v2128_v8 = vmul.f32 %v4250_v22, %v4863_v7 }
 0x742   :  { %v2064_v46 = vpop.xlane.xlu0 %2063 }
 0x743   :  { %4263 = vrcp.f32 %v2064_v46 }
 0x744   :  { %4063 = vmatmul.mubr.msk.f32.gmra.mxu0 %vm553_vm2, %v2136_v20 }
 0x745   :  { %4075 = vmatprep.mubr.msk.f32.mxu0 %vm553_vm2, %v2146_v52 }
 0x746   :  { %v2061_v2 = vpop.xlane.xlu0 %2060 }
 0x747   :  { %v4252_v39 = vpop.eup %4251  ;;  %4265 = vrcp.f32 %v2061_v2 }
 0x748   :  { %v4254_v36 = vpop.eup %4253  ;;  %4076 = vmatmul.mubr.msk.f32.vlgmr.msra.gmra.mxu0 %vm553_vm2, %v2148_v27  ;;  %v2138_v38 = vmul.f32 %v4252_v39, %v4878_v55 }
 0x749   :  { %v4256_v58 = vpop.eup %4255  ;;  %v2097_v61 = vpop.xlane.xlu1 %2096  ;;  %v2126_v29 = vmul.f32 %v4254_v36, %v4882_v17 }
 0x74a   :  { %v4258_v35 = vpop.eup %4257  ;;  %v2140_v51 = vmul.f32 %v4256_v58, %v4859_v32 }
 0x74b   :  { %v4260_v41 = vpop.eup %4259  ;;  %4054 = vmatprep.mubr.msk.f32.mxu1 %vm553_vm2, %v2126_v29  ;;  %v2152_v17 = vmul.f32 %v4258_v35, %v4872_v62 }
 0x74c   :  { %v4262_v53 = vpop.eup %4261  ;;  %4055 = vmatmul.mubr.msk.f32.gmra.mxu1 %vm553_vm2, %v2128_v8  ;;  %v2162_v7 = vmul.f32 %v4260_v41, %v4888_v1 }
 0x74d   :  { %v2082_v40 = vpop.xlane.xlu1 %2081  ;;  %4067 = vmatprep.mubr.msk.f32.mxu1 %vm553_vm2, %v2138_v38  ;;  %v2088_v44 = vpop.xlane.xlu0 %2087  ;;  %v2150_v6 = vmul.f32 %v4262_v53, %v4892_v26 }
 0x74e   :  { %4267 = vrcp.f32 %v2082_v40 }
 0x74f   :  { %4078 = vmatprep.mubr.msk.f32.mxu0 %vm553_vm2, %v2150_v6 }
 0x750   :  { %4068 = vmatmul.mubr.msk.f32.vlgmr.msra.gmra.mxu1 %vm553_vm2, %v2140_v51  ;;  %4079 = vmatmul.mubr.msk.f32.gmra.mxu0 %vm553_vm2, %v2152_v17  ;;  %v4264_v26 = vpop.eup %4263 }
 0x751   :  { %4082 = vmatpush3.msra.mxu1 %v4961_v18  ;;  %v2079_v55 = vpop.xlane.xlu1 %2078  ;;  %4091 = vmatprep.mubr.msk.f32.mxu0 %vm553_vm2, %v2162_v7  ;;  %v2085_v31 = vpop.xlane.xlu0 %2084  ;;  %v2144_v1 = vmul.f32 %v4264_v26, %v4903_v34 }
 0x752   :  { %4269 = vrcp.f32 %v2079_v55 }
 0x753   :  { %4271 = vrcp.f32 %v2085_v31 }
 0x754   :  { %v4266_v32 = vpop.eup %4265  ;;  %4273 = vrcp.f32 %v2088_v44 }
 0x755   :  { %v2106_v62 = vpop.xlane.xlu1 %2105  ;;  %v2142_v42 = vmul.f32 %v4266_v32, %v4913_v21 }
 0x756   :  { %4275 = vrcp.f32 %v2106_v62 }
 0x757   :  { %4070 = vmatprep.mubr.msk.f32.mxu1 %vm553_vm2, %v2142_v42 }
 0x758   :  { %4071 = vmatmul.mubr.msk.f32.gmra.mxu1 %vm553_vm2, %v2144_v1 }
 0x759   :  { %v2103_v18 = vpop.xlane.xlu1 %2102 }
 0x75a   :  { %4277 = vrcp.f32 %v2103_v18 }
 0x75b   :  { %v4268_v56 = vpop.eup %4267  ;;  %4279 = vrcp.f32 %v4969_v4 }
 0x75c   :  { %v2156_v25 = vmul.f32 %v4268_v56, %v4922_v47  ;;  %4281 = vrcp.f32 %v2097_v61 }
 0x75d   :  { %v2112_v33 = vpop.xlane.xlu1 %2111  ;;  %4283 = vrcp.f32 %v4991_v0 }
 0x75e   :  { %4285 = vrcp.f32 %v2112_v33 }
 0x75f   :  { %v4270_v37 = vpop.eup %4269 }
 0x760   :  { %v4272_v19 = vpop.eup %4271  ;;  %v2154_v5 = vmul.f32 %v4270_v37, %v4926_v49 }
 0x761   :  { %v2886_v9 = vpop.permute.xlu1 %2885  ;;  %v4274_v3 = vpop.eup %4273  ;;  %v2158_v34 = vmul.f32 %v4272_v19, %v4932_v13 }
 0x762   :  { %4083 = vmatprep.mubr.msk.f32.mxu1 %vm553_vm2, %v2154_v5  ;;  %4097 = vmatprep.subr.mxu1 %v2886_v9  ;;  %v2160_v21 = vmul.f32 %v4274_v3, %v4924_v14 }
 0x763   :  { %4084 = vmatmul.mubr.msk.f32.vlgmr.msra.gmra.mxu1 %vm553_vm2, %v2156_v25  ;;  %v4276_v57 = vpop.eup %4275 }
 0x764   :  { %4098 = vmatpush3.msra.mxu1 %v2886_v9  ;;  %4086 = vmatprep.mubr.msk.f32.mxu1 %vm553_vm2, %v2158_v34  ;;  %v2172_v49 = vmul.f32 %v4276_v57, %v4938_v28 }
 0x767   :  { %v4278_v15 = vpop.eup %4277  ;;  %4087 = vmatmul.mubr.msk.f32.gmra.mxu1 %vm553_vm2, %v2160_v21 }
 0x768   :  { %v2170_v47 = vmul.f32 %v4278_v15, %v4942_v59  ;;  %v4280_v14 = vpop.eup %4279 }
 0x769   :  { %v4282_v12 = vpop.eup %4281  ;;  %v2164_v10 = vmul.f32 %v4280_v14, %v4868_v43 }
 0x76a   :  { %4099 = vmatprep.mubr.msk.f32.mxu1 %vm553_vm2, %v2170_v47  ;;  %v4284_v59 = vpop.eup %4283  ;;  %v2166_v28 = vmul.f32 %v4282_v12, %v4918_v60 }
 0x76b   :  { %4100 = vmatmul.mubr.msk.f32.vlgmr.msra.gmra.mxu1 %vm553_vm2, %v2172_v49  ;;  %v2168_v4 = vmul.f32 %v4284_v59, %v4906_v24  ;;  %v4286_v48 = vpop.eup %4285 }
 0x76c   :  { %v2176_v23 = vmul.f32 %v4286_v48, %v4946_v63 }
 0x786   :  { %v2109_v13 = vpop.xlane.xlu0 %2108 }
 0x787   :  { %4287 = vrcp.f32 %v2109_v13 }
 0x78a   :  { %v2785_v16 = vpop.permute.xlu0 %2784 }
 0x78b   :  { %4089 = vmatprep.subr.mxu0 %v2785_v16 }
 0x78c   :  { %4090 = vmatpush3.msra.mxu0 %v2785_v16 }
 0x78d   :  { %4092 = vmatmul.mubr.msk.f32.vlgmr.msra.gmra.mxu0 %vm553_vm2, %v2164_v10 }
 0x78e   :  { %4094 = vmatprep.mubr.msk.f32.mxu0 %vm553_vm2, %v2166_v28 }
 0x791   :  { %4095 = vmatmul.mubr.msk.f32.gmra.mxu0 %vm553_vm2, %v2168_v4 }
 0x794   :  { %v4288_v50 = vpop.eup %4287 }
 0x795   :  { %v2174_v54 = vmul.f32 %v4288_v50, %v4955_v45 }
 0x797   :  { %4102 = vmatprep.mubr.msk.f32.mxu1 %vm553_vm2, %v2174_v54 }
 0x798   :  { %4103 = vmatmul.mubr.msk.f32.gmra.mxu1 %vm553_vm2, %v2176_v23 }
 0x7f0   :  { %v4045_v43 = vpop.f32.mrf.mxu0 }
 0x7f1   :  { %v3017_v60 = vrot.slane %v4045_v43, 7  ;;  %v3289_v46 = vrot.slane %v4045_v43, 3  ;;  %v3153_v2 = vrot.slane %v4045_v43, 1  ;;  %v3221_v39 = vrot.slane %v4045_v43, 2 }
 0x7f2   :  { %v2259_v30 = vpop.f32.mrf.mxu0  ;;  %v3349_v36 = vrot.slane %v4045_v43, 4  ;;  %v3417_v61 = vrot.slane %v4045_v43, 5  ;;  %v3485_v29 = vrot.slane %v4045_v43, 6 }
 0x7f3   :  { %v3288_v20 = vrot.slane %v2259_v30, 4  ;;  %v5040_v24 = vsel %vm3018_vm4, %v3017_v60, %v2259_v30  ;;  %v3084_v52 = vrot.slane %v2259_v30, 1  ;;  %v3152_v45 = vrot.slane %v2259_v30, 2 }
 0x7f4   :  { %v3220_v0 = vrot.slane %v2259_v30, 3  ;;  %v3348_v63 = vrot.slane %v2259_v30, 5  ;;  %v3416_v22 = vrot.slane %v2259_v30, 6  ;;  %v3484_v27 = vrot.slane %v2259_v30, 7 }
 0x7f5   :  { %v5043_v11 = vsel %vm3018_vm4, %v3289_v46, %v3288_v20  ;;  %v3085_v8 = vsel %vm3018_vm4, %v4045_v43, %v3084_v52  ;;  %v3154_v40 = vsel %vm3018_vm4, %v3153_v2, %v3152_v45 }
 0x7f6   :  { %v3418_v38 = vsel %vm3018_vm4, %v3417_v61, %v3416_v22  ;;  %v3350_v53 = vsel %vm3018_vm4, %v3349_v36, %v3348_v63  ;;  %v5056_v44 = vsel %vm3018_vm4, %v3221_v39, %v3220_v0  ;;  %v5064_v55 = vsel %vm3018_vm4, %v3485_v29, %v3484_v27 }
 0x7fb   :  { %v5045_v58 = vpop.f32.mrf.mxu1 }
 0x7fc   :  { %v5047_v35 = vpop.f32.mrf.mxu0  ;;  %v3425_v51 = vrot.slane %v5045_v58, 1  ;;  %v3092_v17 = vrot.slane %v5045_v58, 4  ;;  %v3160_v32 = vrot.slane %v5045_v58, 5  ;;  %v3228_v62 = vrot.slane %v5045_v58, 6 }
 0x7fd   :  { %v5050_v41 = vpop.f32.mrf.mxu1  ;;  %v3156_v7 = vrot.slane %v5047_v35, 7  ;;  %v3421_v1 = vrot.slane %v5047_v35, 3  ;;  %v3088_v33 = vrot.slane %v5047_v35, 6  ;;  %v3353_v56 = vrot.slane %v5047_v35, 2 }
 0x7fe   :  { %v5058_v6 = vpop.f32.mrf.mxu0  ;;  %v3423_v18 = vrot.slane %v5050_v41, 2  ;;  %v3090_v19 = vrot.slane %v5050_v41, 5  ;;  %v3355_v25 = vrot.slane %v5050_v41, 1  ;;  %v3158_v21 = vrot.slane %v5050_v41, 6 }
 0x7ff   :  { %v3419_v31 = vrot.slane %v5058_v6, 4  ;;  %v3155_v26 = vsel %vm3021_vm5, %v5058_v6, %v3154_v40  ;;  %v3086_v37 = vrot.slane %v5058_v6, 7  ;;  %v3351_v5 = vrot.slane %v5058_v6, 3 }
 0x800   :  { %v5071_v42 = vpop.f32.mrf.mxu0  ;;  %v3157_v34 = vsel %vm3024_vm6, %v3156_v7, %v3155_v26  ;;  %v3223_v57 = vrot.slane %v5058_v6, 1  ;;  %v3226_v49 = vrot.slane %v5050_v41, 7  ;;  %v3487_v13 = vrot.slane %v5058_v6, 5 }
 0x801   :  { %v3420_v3 = vsel %vm3021_vm5, %v3419_v31, %v3418_v38  ;;  %v3167_v15 = vrot.slane %v5071_v42, 1  ;;  %v3235_v47 = vrot.slane %v5071_v42, 2  ;;  %v3363_v14 = vrot.slane %v5071_v42, 4 }
 0x802   :  { %v5081_v9 = vpop.f32.mrf.mxu0  ;;  %v3431_v12 = vrot.slane %v5071_v42, 5  ;;  %v3499_v16 = vrot.slane %v5071_v42, 6  ;;  %v3422_v59 = vsel %vm3024_vm6, %v3421_v1, %v3420_v3  ;;  %v3087_v48 = vsel %vm3021_vm5, %v3086_v37, %v3085_v8 }
 0x803   :  { %v3430_v28 = vrot.slane %v5081_v9, 6  ;;  %v3424_v4 = vsel %vm3027_vm7, %v3423_v18, %v3422_v59  ;;  %v3352_v50 = vsel %vm3021_vm5, %v3351_v5, %v3350_v53  ;;  %v3098_v54 = vrot.slane %v5081_v9, 1 }
 0x804   :  { %v5094_v10 = vpop.f32.mrf.mxu0  ;;  %v3089_v43 = vsel %vm3024_vm6, %v3088_v33, %v3087_v48  ;;  %v3354_v60 = vsel %vm3024_vm6, %v3353_v56, %v3352_v50  ;;  %v3159_v30 = vsel %vm3027_vm7, %v3158_v21, %v3157_v34  ;;  %v3166_v46 = vrot.slane %v5081_v9, 2 }
 0x805   :  { %v3091_v20 = vsel %vm3027_vm7, %v3090_v19, %v3089_v43  ;;  %v3356_v52 = vsel %vm3027_vm7, %v3355_v25, %v3354_v60  ;;  %v3234_v0 = vrot.slane %v5081_v9, 3  ;;  %v3362_v63 = vrot.slane %v5081_v9, 5 }
 0x806   :  { %v5102_v23 = vpop.f32.mrf.mxu0  ;;  %v3498_v22 = vrot.slane %v5081_v9, 7  ;;  %v3426_v2 = vsel %vm3030_vm8, %v3425_v51, %v3424_v4  ;;  %v3093_v39 = vsel %vm3030_vm8, %v3092_v17, %v3091_v20  ;;  %v3357_v36 = vsel %vm3030_vm8, %v5045_v58, %v3356_v52 }
 0x807   :  { %v3433_v45 = vrot.slane %v5102_v23, 4  ;;  %v3161_v61 = vsel %vm3030_vm8, %v3160_v32, %v3159_v30  ;;  %v3432_v29 = vsel %vm3018_vm4, %v3431_v12, %v3430_v28  ;;  %v3435_v40 = vrot.slane %v5094_v10, 3 }
 0x808   :  { %v5114_v27 = vpop.f32.mrf.mxu0  ;;  %v3224_v51 = vsel %vm3021_vm5, %v3223_v57, %v5056_v44  ;;  %v3100_v57 = vrot.slane %v5102_v23, 7  ;;  %v3099_v30 = vsel %vm3018_vm4, %v5071_v42, %v3098_v54 }
 0x809   :  { %v3181_v8 = vrot.slane %v5114_v27, 1  ;;  %v3434_v53 = vsel %vm3021_vm5, %v3433_v45, %v3432_v29  ;;  %v3249_v17 = vrot.slane %v5114_v27, 2  ;;  %v3377_v7 = vrot.slane %v5114_v27, 4 }
 0x80a   :  { %v5123_v38 = vpop.f32.mrf.mxu0  ;;  %v3445_v31 = vrot.slane %v5114_v27, 5  ;;  %v3436_v5 = vsel %vm3024_vm6, %v3435_v40, %v3434_v53  ;;  %v3225_v34 = vsel %vm3024_vm6, %v5047_v35, %v3224_v51 }
 0x80b   :  { %v3112_v26 = vrot.slane %v5123_v38, 1  ;;  %v3180_v32 = vrot.slane %v5123_v38, 2  ;;  %v3248_v1 = vrot.slane %v5123_v38, 3  ;;  %v3376_v18 = vrot.slane %v5123_v38, 5 }
 0x80c   :  { %v3444_v33 = vrot.slane %v5123_v38, 6  ;;  %v5137_v56 = vpop.f32.mrf.mxu1  ;;  %v3227_v43 = vsel %vm3027_vm7, %v3226_v49, %v3225_v34  ;;  %v3489_v34 = vrot.slane %v5047_v35, 4 }
 0x80d   :  { %v3428_v44 = vrot.slane %v5137_v56, 7  ;;  %v3096_v37 = vrot.slane %v5137_v56, 2  ;;  %v3360_v19 = vrot.slane %v5137_v56, 6  ;;  %v3164_v3 = vrot.slane %v5137_v56, 3 }
 0x80e   :  { %v5143_v25 = vpop.f32.mrf.mxu1  ;;  %v3232_v21 = vrot.slane %v5137_v56, 4  ;;  %v3229_v54 = vsel %vm3030_vm8, %v3228_v62, %v3227_v43 }
 0x80f   :  { %v3427_v12 = vsel %vm3033_vm9, %v5143_v25, %v3426_v2  ;;  %v3094_v59 = vrot.slane %v5143_v25, 3  ;;  %v3358_v28 = vrot.slane %v5143_v25, 7  ;;  %v3162_v4 = vrot.slane %v5143_v25, 4 }
 0x810   :  { %v5155_v48 = vpop.f32.mrf.mxu1  ;;  %v3429_v50 = vsel %vm3036_vm10, %v3428_v44, %v3427_v12  ;;  %v3230_v60 = vrot.slane %v5143_v25, 5  ;;  %v3101_v2 = vsel %vm3021_vm5, %v3100_v57, %v3099_v30  ;;  %v5199_v43 = vpop.f32.mrf.mxu0  ;;  %v3364_v30 = vsel %vm3018_vm4, %v3363_v14, %v3362_v63 }
 0x811   :  { %3472 = vrot.lane.b32.xlu0 %v3429_v50, %s4343_s15  ;;  %v3095_v20 = vsel %vm3033_vm9, %v3094_v59, %v3093_v39  ;;  %v3359_v52 = vsel %vm3033_vm9, %v3358_v28, %v3357_v36  ;;  %v3163_v45 = vsel %vm3033_vm9, %v3162_v4, %v3161_v61  ;;  %v3439_v40 = vrot.slane %v5155_v48, 1 }
 0x812   :  { %v5167_v29 = vpop.f32.mrf.mxu1  ;;  %v3097_v49 = vsel %vm3036_vm10, %v3096_v37, %v3095_v20  ;;  %v3361_v53 = vsel %vm3036_vm10, %v3360_v19, %v3359_v52  ;;  %v3231_v36 = vsel %vm3033_vm9, %v3230_v60, %v3229_v54  ;;  %v3102_v61 = vrot.slane %v5094_v10, 6 }
 0x813   :  { %v3437_v39 = vrot.slane %v5167_v29, 2  ;;  %v3104_v51 = vrot.slane %v5167_v29, 5  ;;  %v3165_v44 = vsel %vm3036_vm10, %v3164_v3, %v3163_v45  ;;  %v3233_v37 = vsel %vm3036_vm10, %v3232_v21, %v3231_v36 }
 0x814   :  { %v3488_v19 = vsel %vm3021_vm5, %v3487_v13, %v5064_v55  ;;  %v3103_v57 = vsel %vm3024_vm6, %v3102_v61, %v3101_v2  ;;  %v3106_v12 = vrot.slane %v5155_v48, 4  ;;  %v3491_v3 = vrot.slane %v5050_v41, 3 }
 0x815   :  { %3140 = vrot.lane.b32.xlu0 %v3097_v49, %s4344_s16  ;;  %v3438_v62 = vsel %vm3027_vm7, %v3437_v39, %v3436_v5  ;;  %v3105_v21 = vsel %vm3027_vm7, %v3104_v51, %v3103_v57  ;;  %v3490_v59 = vsel %vm3024_vm6, %v3489_v34, %v3488_v19  ;;  %v3493_v28 = vrot.slane %v5045_v58, 2  ;;  %v5232_v19 = vpop.f32.mrf.mxu0 }
 0x816   :  { %v3495_v55 = vrot.slane %v5143_v25, 1  ;;  %v3440_v13 = vsel %vm3030_vm8, %v3439_v40, %v3438_v62  ;;  %v3107_v4 = vsel %vm3030_vm8, %v3106_v12, %v3105_v21  ;;  %v3492_v5 = vsel %vm3027_vm7, %v3491_v3, %v3490_v59 }
 0x817   :  { %v3365_v50 = vrot.slane %v5102_v23, 3  ;;  %v3367_v20 = vrot.slane %v5094_v10, 2  ;;  %v3369_v52 = vrot.slane %v5167_v29, 1  ;;  %v3168_v45 = vsel %vm3018_vm4, %v3167_v15, %v3166_v46 }
 0x818   :  { %v5201_v60 = vpop.f32.mrf.mxu1  ;;  %v3494_v40 = vsel %vm3030_vm8, %v3493_v28, %v3492_v5  ;;  %v3169_v15 = vsel %vm3021_vm5, %v5102_v23, %v3168_v45  ;;  %v3170_v57 = vrot.slane %v5094_v10, 7  ;;  %v3172_v12 = vrot.slane %v5167_v29, 6 }
 0x819   :  { %3404 = vrot.lane.b32.xlu0 %v3361_v53, %s4344_s16  ;;  %v3442_v2 = vrot.slane %v5201_v60, 7  ;;  %v3110_v49 = vrot.slane %v5201_v60, 2  ;;  %v3366_v14 = vsel %vm3021_vm5, %v3365_v50, %v3364_v30  ;;  %v3496_v54 = vsel %vm3033_vm9, %v3495_v55, %v3494_v40 }
 0x81a   :  { %v5220_v63 = vpop.f32.mrf.mxu1  ;;  %v3368_v39 = vsel %vm3024_vm6, %v3367_v20, %v3366_v14  ;;  %v3374_v36 = vrot.slane %v5201_v60, 6  ;;  %v3497_v21 = vsel %vm3036_vm10, %v5137_v56, %v3496_v54  ;;  %v3171_v5 = vsel %vm3024_vm6, %v3170_v57, %v3169_v15 }
 0x81b   :  { %v3441_v46 = vsel %vm3033_vm9, %v5220_v63, %v3440_v13  ;;  %v3108_v53 = vrot.slane %v5220_v63, 3  ;;  %v3370_v61 = vsel %vm3027_vm7, %v3369_v52, %v3368_v39  ;;  %v3372_v51 = vrot.slane %v5220_v63, 7 }
 0x81c   :  { %v3443_v34 = vsel %vm3036_vm10, %v3442_v2, %v3441_v46  ;;  %v3371_v62 = vsel %vm3030_vm8, %v5155_v48, %v3370_v61  ;;  %v3176_v28 = vrot.slane %v5220_v63, 4  ;;  %v3174_v50 = vrot.slane %v5155_v48, 5 }
 0x81d   :  { %3208 = vrot.lane.b32.xlu0 %v3165_v44, %s4343_s15  ;;  %3474 = vrot.lane.b32.xlu1 %v3443_v34, %s4343_s15  ;;  %v3109_v3 = vsel %vm3033_vm9, %v3108_v53, %v3107_v4  ;;  %v3373_v59 = vsel %vm3033_vm9, %v3372_v51, %v3371_v62  ;;  %v3173_v44 = vsel %vm3027_vm7, %v3172_v12, %v3171_v5  ;;  %v3178_v30 = vrot.slane %v5201_v60, 3 }
 0x81e   :  { %v3111_v55 = vsel %vm3036_vm10, %v3110_v49, %v3109_v3  ;;  %v3375_v13 = vsel %vm3036_vm10, %v3374_v36, %v3373_v59  ;;  %v3446_v4 = vsel %vm3018_vm4, %v3445_v31, %v3444_v33  ;;  %v3447_v20 = vrot.slane %v5232_v19, 4 }
 0x81f   :  { %v3175_v52 = vsel %vm3030_vm8, %v3174_v50, %v3173_v44  ;;  %v3449_v45 = vrot.slane %v5199_v43, 3  ;;  %v3237_v2 = vrot.slane %v5102_v23, 1  ;;  %v3240_v49 = vrot.slane %v5167_v29, 7 }
 0x820   :  { %v3177_v40 = vsel %vm3033_vm9, %v3176_v28, %v3175_v52  ;;  %v3448_v14 = vsel %vm3021_vm5, %v3447_v20, %v3446_v4  ;;  %v3236_v31 = vsel %vm3018_vm4, %v3235_v47, %v3234_v0  ;;  %v3242_v33 = vrot.slane %v5155_v48, 6 }
 0x821   :  { %3276 = vrot.lane.b32.xlu0 %v3233_v37, %s4342_s7  ;;  %3142 = vrot.lane.b32.xlu1 %v3111_v55, %s4344_s16  ;;  %v3179_v54 = vsel %vm3036_vm10, %v3178_v30, %v3177_v40  ;;  %v3450_v39 = vsel %vm3024_vm6, %v3449_v45, %v3448_v14  ;;  %v3238_v37 = vsel %vm3021_vm5, %v3237_v2, %v3236_v31  ;;  %v3244_v36 = vrot.slane %v5220_v63, 5 }
 0x822   :  { %v3239_v46 = vsel %vm3024_vm6, %v5094_v10, %v3238_v37  ;;  %v3246_v53 = vrot.slane %v5201_v60, 4  ;;  %v3113_v47 = vsel %vm3018_vm4, %v5114_v27, %v3112_v26  ;;  %v3114_v0 = vrot.slane %v5232_v19, 7 }
 0x823   :  { %v5276_v15 = vpop.f32.mrf.mxu1  ;;  %v3241_v51 = vsel %vm3027_vm7, %v3240_v49, %v3239_v46  ;;  %v3116_v34 = vrot.slane %v5199_v43, 6  ;;  %v3500_v3 = vsel %vm3018_vm4, %v3499_v16, %v3498_v22  ;;  %v3501_v59 = vrot.slane %v5102_v23, 5 }
 0x824   :  { %v3453_v61 = vrot.slane %v5276_v15, 1  ;;  %v3120_v62 = vrot.slane %v5276_v15, 4  ;;  %v3243_v12 = vsel %vm3030_vm8, %v3242_v33, %v3241_v51  ;;  %v3115_v26 = vsel %vm3021_vm5, %v3114_v0, %v3113_v47 }
 0x825   :  { %3540 = vrot.lane.b32.xlu0 %v3497_v21, %s4342_s7  ;;  %3406 = vrot.lane.b32.xlu1 %v3375_v13, %s4344_s16  ;;  %v5292_v57 = vpop.f32.mrf.mxu1  ;;  %v3245_v21 = vsel %vm3033_vm9, %v3244_v36, %v3243_v12  ;;  %v3503_v13 = vrot.slane %v5094_v10, 4  ;;  %v3117_v44 = vsel %vm3024_vm6, %v3116_v34, %v3115_v26  ;;  %v3502_v30 = vsel %vm3021_vm5, %v3501_v59, %v3500_v3 }
 0x826   :  { %v3451_v28 = vrot.slane %v5292_v57, 2  ;;  %v3118_v55 = vrot.slane %v5292_v57, 5  ;;  %v3247_v50 = vsel %vm3036_vm10, %v3246_v53, %v3245_v21  ;;  %v3505_v16 = vrot.slane %v5167_v29, 3 }
 0x827   :  { %v5306_v5 = vpop.f32.mrf.mxu1  ;;  %v3507_v52 = vrot.slane %v5155_v48, 2  ;;  %v3504_v40 = vsel %vm3024_vm6, %v3503_v13, %v3502_v30  ;;  %v3509_v14 = vrot.slane %v5220_v63, 1  ;;  %v3378_v46 = vsel %vm3018_vm4, %v3377_v7, %v3376_v18 }
 0x828   :  { %v3452_v22 = vsel %vm3027_vm7, %v3451_v28, %v3450_v39  ;;  %v3456_v4 = vrot.slane %v5306_v5, 7  ;;  %v3119_v20 = vsel %vm3027_vm7, %v3118_v55, %v3117_v44  ;;  %v3124_v49 = vrot.slane %v5306_v5, 2 }
 0x829   :  { %3210 = vrot.lane.b32.xlu1 %v3179_v54, %s4343_s15  ;;  %v5317_v45 = vpop.f32.mrf.mxu1  ;;  %v3454_v2 = vsel %vm3030_vm8, %v3453_v61, %v3452_v22  ;;  %v3121_v33 = vsel %vm3030_vm8, %v3120_v62, %v3119_v20  ;;  %v3506_v37 = vsel %vm3027_vm7, %v3505_v16, %v3504_v40  ;;  %v3379_v53 = vrot.slane %v5232_v19, 3 }
 0x82a   :  { %v3455_v31 = vsel %vm3033_vm9, %v5317_v45, %v3454_v2  ;;  %v3122_v39 = vrot.slane %v5317_v45, 3  ;;  %v3508_v36 = vsel %vm3030_vm8, %v3507_v52, %v3506_v37  ;;  %v3381_v61 = vrot.slane %v5199_v43, 2 }
 0x82b   :  { %v3457_v54 = vsel %vm3036_vm10, %v3456_v4, %v3455_v31  ;;  %v3510_v0 = vsel %vm3033_vm9, %v3509_v14, %v3508_v36  ;;  %v3383_v51 = vrot.slane %v5292_v57, 1  ;;  %v3512_v34 = vrot.slane %v5123_v38, 7 }
 0x82c   :  { %3476 = vrot.lane.b32.xlu0 %v3457_v54, %s4343_s15  ;;  %v3123_v47 = vsel %vm3033_vm9, %v3122_v39, %v3121_v33  ;;  %v3380_v7 = vsel %vm3021_vm5, %v3379_v53, %v3378_v46  ;;  %v3386_v18 = vrot.slane %v5317_v45, 7  ;;  %v3182_v26 = vsel %vm3018_vm4, %v3181_v8, %v3180_v32 }
 0x82d   :  { %3278 = vrot.lane.b32.xlu1 %v3247_v50, %s4342_s7  ;;  %v3125_v62 = vsel %vm3036_vm10, %v3124_v49, %v3123_v47  ;;  %v3382_v12 = vsel %vm3024_vm6, %v3381_v61, %v3380_v7  ;;  %v3184_v3 = vrot.slane %v5199_v43, 7  ;;  %v3186_v59 = vrot.slane %v5292_v57, 6 }
 0x82e   :  { %v3511_v28 = vsel %vm3036_vm10, %v5201_v60, %v3510_v0  ;;  %v3384_v21 = vsel %vm3027_vm7, %v3383_v51, %v3382_v12  ;;  %v3388_v55 = vrot.slane %v5306_v5, 6  ;;  %v3183_v13 = vsel %vm3021_vm5, %v5232_v19, %v3182_v26 }
 0x82f   :  { %v3385_v50 = vsel %vm3030_vm8, %v5276_v15, %v3384_v21  ;;  %v3185_v8 = vsel %vm3024_vm6, %v3184_v3, %v3183_v13  ;;  %v3188_v32 = vrot.slane %v5276_v15, 5  ;;  %v3190_v44 = vrot.slane %v5317_v45, 4 }
 0x830   :  { %3144 = vrot.lane.b32.xlu0 %v3125_v62, %s4344_s16  ;;  %v3387_v30 = vsel %vm3033_vm9, %v3386_v18, %v3385_v50  ;;  %v3187_v16 = vsel %vm3027_vm7, %v3186_v59, %v3185_v8  ;;  %v3251_v22 = vrot.slane %v5232_v19, 1  ;;  %v3254_v4 = vrot.slane %v5292_v57, 7 }
 0x831   :  { %3542 = vrot.lane.b32.xlu1 %v3511_v28, %s4342_s7  ;;  %v3513_v20 = vrot.slane %v5114_v27, 6  ;;  %v3192_v52 = vrot.slane %v5306_v5, 3  ;;  %v3250_v2 = vsel %vm3018_vm4, %v3249_v17, %v3248_v1  ;;  %v3389_v49 = vsel %vm3036_vm10, %v3388_v55, %v3387_v30 }
 0x832   :  { %v3189_v40 = vsel %vm3030_vm8, %v3188_v32, %v3187_v16  ;;  %v3252_v14 = vsel %vm3021_vm5, %v3251_v22, %v3250_v2  ;;  %v3256_v31 = vrot.slane %v5276_v15, 6  ;;  %v3258_v37 = vrot.slane %v5317_v45, 5 }
 0x833   :  { %v3191_v33 = vsel %vm3033_vm9, %v3190_v44, %v3189_v40  ;;  %v3253_v39 = vsel %vm3024_vm6, %v5199_v43, %v3252_v14  ;;  %v3515_v54 = vrot.slane %v5232_v19, 5  ;;  %v3514_v1 = vsel %vm3018_vm4, %v3513_v20, %v3512_v34 }
 0x834   :  { %3408 = vrot.lane.b32.xlu0 %v3389_v49, %s4344_s16  ;;  %v3255_v17 = vsel %vm3027_vm7, %v3254_v4, %v3253_v39  ;;  %v3517_v36 = vrot.slane %v5199_v43, 4  ;;  %v3519_v46 = vrot.slane %v5292_v57, 3  ;;  %v3523_v47 = vrot.slane %v5317_v45, 1 }
 0x835   :  { %v3516_v53 = vsel %vm3021_vm5, %v3515_v54, %v3514_v1  ;;  %v3193_v0 = vsel %vm3036_vm10, %v3192_v52, %v3191_v33  ;;  %v3257_v61 = vsel %vm3030_vm8, %v3256_v31, %v3255_v17  ;;  %v3521_v62 = vrot.slane %v5276_v15, 2 }
 0x836   :  { %v3518_v51 = vsel %vm3024_vm6, %v3517_v36, %v3516_v53  ;;  %v3259_v34 = vsel %vm3033_vm9, %v3258_v37, %v3257_v61  ;;  %v3038_v18 = vrot.slane %v5071_v42, 7  ;;  %v3260_v12 = vrot.slane %v5306_v5, 4 }
 0x837   :  { %v3520_v7 = vsel %vm3027_vm7, %v3519_v46, %v3518_v51  ;;  %v3303_v3 = vrot.slane %v5071_v42, 3  ;;  %v3302_v59 = vrot.slane %v5081_v9, 4  ;;  %v3020_v21 = vrot.slane %v5058_v6, 6 }
 0x838   :  { %3212 = vrot.lane.b32.xlu0 %v3193_v0, %s4343_s15  ;;  %v3522_v26 = vsel %vm3030_vm8, %v3521_v62, %v3520_v7  ;;  %v3052_v55 = vrot.slane %v5114_v27, 7  ;;  %v3261_v13 = vsel %vm3036_vm10, %v3260_v12, %v3259_v34  ;;  %v3023_v8 = vrot.slane %v5047_v35, 5 }
 0x839   :  { %v3524_v28 = vsel %vm3033_vm9, %v3523_v47, %v3522_v26  ;;  %v3022_v42 = vsel %vm3021_vm5, %v3020_v21, %v5040_v24  ;;  %v3026_v32 = vrot.slane %v5050_v41, 4  ;;  %v3032_v44 = vrot.slane %v5143_v25, 2 }
 0x83a   :  { %v3525_v50 = vsel %vm3036_vm10, %v5306_v5, %v3524_v28  ;;  %v3291_v30 = vrot.slane %v5058_v6, 2  ;;  %v3025_v16 = vsel %vm3024_vm6, %v3023_v8, %v3022_v42  ;;  %v3029_v22 = vrot.slane %v5045_v58, 3 }
 0x83b   :  { %v3035_v4 = vrot.slane %v5137_v56, 1  ;;  %v3293_v20 = vrot.slane %v5047_v35, 1  ;;  %v3028_v52 = vsel %vm3027_vm7, %v3026_v32, %v3025_v16  ;;  %v3296_v24 = vrot.slane %v5045_v58, 7 }
 0x83c   :  { %3280 = vrot.lane.b32.xlu0 %v3261_v13, %s4342_s7  ;;  %v3292_v2 = vsel %vm3021_vm5, %v3291_v30, %v5043_v11  ;;  %v3298_v49 = vrot.slane %v5143_v25, 6  ;;  %v3031_v40 = vsel %vm3030_vm8, %v3029_v22, %v3028_v52  ;;  %v3039_v14 = vsel %vm3018_vm4, %v3038_v18, %v5081_v9 }
 0x83d   :  { %v3294_v6 = vsel %vm3024_vm6, %v3293_v20, %v3292_v2  ;;  %v3040_v31 = vrot.slane %v5102_v23, 6  ;;  %v3034_v35 = vsel %vm3033_vm9, %v3032_v44, %v3031_v40  ;;  %v3042_v58 = vrot.slane %v5094_v10, 5 }
 0x83e   :  { %v3295_v11 = vsel %vm3027_vm7, %v5050_v41, %v3294_v6  ;;  %v3044_v25 = vrot.slane %v5167_v29, 4  ;;  %v5440_v33 = vsel %vm3036_vm10, %v3035_v4, %v3034_v35  ;;  %v3300_v9 = vrot.slane %v5137_v56, 5 }
 0x83f   :  { %v3297_v39 = vsel %vm3030_vm8, %v3296_v24, %v3295_v11  ;;  %v3041_v37 = vsel %vm3021_vm5, %v3040_v31, %v3039_v14  ;;  %v3046_v1 = vrot.slane %v5155_v48, 3  ;;  %v3048_v41 = vrot.slane %v5220_v63, 2 }
 0x840   :  { %3544 = vrot.lane.b32.xlu0 %v3525_v50, %s4342_s7  ;;  %v3299_v54 = vsel %vm3033_vm9, %v3298_v49, %v3297_v39  ;;  %v3043_v17 = vsel %vm3024_vm6, %v3042_v58, %v3041_v37  ;;  %v3317_v36 = vrot.slane %v5114_v27, 3  ;;  %v3304_v47 = vsel %vm3018_vm4, %v3303_v3, %v3302_v59  ;;  %v5470_v59 = vpop.f32.mrf.mxu1 }
 0x841   :  { %v5451_v46 = vsel %vm3036_vm10, %v3300_v9, %v3299_v54  ;;  %v3045_v53 = vsel %vm3027_vm7, %v3044_v25, %v3043_v17  ;;  %v3316_v56 = vrot.slane %v5123_v38, 4  ;;  %v3050_v61 = vrot.slane %v5201_v60, 1 }
 0x842   :  { %v3047_v0 = vsel %vm3030_vm8, %v3046_v1, %v3045_v53  ;;  %v3305_v51 = vrot.slane %v5102_v23, 2  ;;  %v3307_v34 = vrot.slane %v5094_v10, 1  ;;  %v3310_v27 = vrot.slane %v5155_v48, 7  ;;  %v5489_v30 = vpop.f32.mrf.mxu1 }
 0x843   :  { %v3049_v62 = vsel %vm3033_vm9, %v3048_v41, %v3047_v0  ;;  %v3053_v7 = vsel %vm3018_vm4, %v3052_v55, %v5123_v38  ;;  %v3312_v26 = vrot.slane %v5220_v63, 6  ;;  %v3054_v3 = vrot.slane %v5232_v19, 6 }
 0x844   :  { %v5465_v18 = vsel %vm3036_vm10, %v3050_v61, %v3049_v62  ;;  %v3306_v12 = vsel %vm3021_vm5, %v3305_v51, %v3304_v47  ;;  %v3314_v10 = vrot.slane %v5201_v60, 5  ;;  %v3056_v48 = vrot.slane %v5199_v43, 5 }
 0x845   :  { %v3308_v23 = vsel %vm3024_vm6, %v3307_v34, %v3306_v12  ;;  %v3058_v28 = vrot.slane %v5292_v57, 4  ;;  %v3055_v21 = vsel %vm3021_vm5, %v3054_v3, %v3053_v7  ;;  %v3062_v55 = vrot.slane %v5317_v45, 2 }
 0x846   :  { %v3309_v38 = vsel %vm3027_vm7, %v5167_v29, %v3308_v23  ;;  %v3318_v63 = vsel %vm3018_vm4, %v3317_v36, %v3316_v56  ;;  %v3057_v50 = vsel %vm3024_vm6, %v3056_v48, %v3055_v21  ;;  %v3060_v8 = vrot.slane %v5276_v15, 3 }
 0x847   :  { %v3311_v13 = vsel %vm3030_vm8, %v3310_v27, %v3309_v38  ;;  %v3319_v60 = vrot.slane %v5232_v19, 2  ;;  %v3059_v32 = vsel %vm3027_vm7, %v3058_v28, %v3057_v50  ;;  %v3064_v29 = vrot.slane %v5306_v5, 1 }
 0x848   :  { %v3313_v42 = vsel %vm3033_vm9, %v3312_v26, %v3311_v13  ;;  %v3321_v44 = vrot.slane %v5199_v43, 1  ;;  %v3061_v22 = vsel %vm3030_vm8, %v3060_v8, %v3059_v32  ;;  %v3324_v20 = vrot.slane %v5276_v15, 7 }
 0x849   :  { %v5492_v16 = vsel %vm3036_vm10, %v3314_v10, %v3313_v42  ;;  %v3320_v4 = vsel %vm3021_vm5, %v3319_v60, %v3318_v63  ;;  %v3063_v19 = vsel %vm3033_vm9, %v3062_v55, %v3061_v22  ;;  %v3326_v49 = vrot.slane %v5317_v45, 6 }
 0x84a   :  { %v3322_v52 = vsel %vm3024_vm6, %v3321_v44, %v3320_v4  ;;  %v5502_v24 = vsel %vm3036_vm10, %v3064_v29, %v3063_v19  ;;  %v3465_v40 = vrot.slane %v5489_v30, 2  ;;  %v3467_v6 = vrot.slane %v5470_v59, 1 }
 0x84b   :  { %v3323_v43 = vsel %vm3027_vm7, %v5292_v57, %v3322_v52  ;;  %v3132_v15 = vrot.slane %v5489_v30, 5  ;;  %v3134_v31 = vrot.slane %v5470_v59, 4  ;;  %v3397_v35 = vrot.slane %v5489_v30, 1 }
 0x84c   :  { %v3200_v11 = vrot.slane %v5489_v30, 6  ;;  %v3325_v58 = vsel %vm3030_vm8, %v3324_v20, %v3323_v43  ;;  %v3202_v25 = vrot.slane %v5470_v59, 5  ;;  %v3268_v39 = vrot.slane %v5489_v30, 7 }
 0x84d   :  { %v5499_v2 = vpop.f32.mrf.mxu0  ;;  %v3270_v37 = vrot.slane %v5470_v59, 6  ;;  %v5524_v54 = vsel %vm3033_vm9, %v3326_v49, %v3325_v58  ;;  %v3328_v17 = vrot.slane %v5306_v5, 5  ;;  %v3072_v1 = vrot.slane %v5489_v30, 4 }
 0x84e   :  { %v3195_v41 = vrot.slane %v5499_v2, 1  ;;  %v3074_v47 = vrot.slane %v5470_v59, 3  ;;  %v3066_v56 = vrot.slane %v5499_v2, 7  ;;  %v3391_v0 = vrot.slane %v5499_v2, 4 }
 0x84f   :  { %v5510_v14 = vpop.f32.mrf.mxu0  ;;  %v3459_v61 = vrot.slane %v5499_v2, 5  ;;  %v3338_v62 = vrot.slane %v5470_v59, 7  ;;  %v3263_v8 = vrot.slane %v5499_v2, 2  ;;  %v3331_v60 = vrot.slane %v5499_v2, 3 }
 0x850   :  { %v3126_v57 = vrot.slane %v5510_v14, 1  ;;  %v3194_v45 = vrot.slane %v5510_v14, 2  ;;  %v3390_v36 = vrot.slane %v5510_v14, 5  ;;  %v3458_v53 = vrot.slane %v5510_v14, 6 }
 0x851   :  { %v5520_v9 = vpop.f32.mrf.mxu0  ;;  %v3262_v44 = vrot.slane %v5510_v14, 3  ;;  %v3526_v19 = vrot.slane %v5510_v14, 7 }
 0x852   :  { %v3463_v27 = vrot.slane %v5520_v9, 3  ;;  %v3127_v7 = vsel %vm3018_vm4, %v5499_v2, %v3126_v57  ;;  %v3196_v12 = vsel %vm3018_vm4, %v3195_v41, %v3194_v45  ;;  %v3130_v23 = vrot.slane %v5520_v9, 6 }
 0x853   :  { %v5535_v51 = vpop.f32.mrf.mxu0  ;;  %v3395_v10 = vrot.slane %v5520_v9, 2  ;;  %v3460_v48 = vsel %vm3018_vm4, %v3459_v61, %v3458_v53  ;;  %v3392_v38 = vsel %vm3018_vm4, %v3391_v0, %v3390_v36  ;;  %v3198_v21 = vrot.slane %v5520_v9, 7 }
 0x854   :  { %v3128_v34 = vrot.slane %v5535_v51, 7  ;;  %v3393_v26 = vrot.slane %v5535_v51, 3  ;;  %v3461_v3 = vrot.slane %v5535_v51, 4  ;;  %v3197_v50 = vsel %vm3021_vm5, %v5535_v51, %v3196_v12 }
 0x855   :  { %v3265_v52 = vrot.slane %v5535_v51, 1  ;;  %v3199_v58 = vsel %vm3024_vm6, %v3198_v21, %v3197_v50  ;;  %v3330_v36 = vrot.slane %v5510_v14, 4  ;;  %v3333_v61 = vrot.slane %v5535_v51, 2 }
 0x856   :  { %v3129_v28 = vsel %vm3021_vm5, %v3128_v34, %v3127_v7  ;;  %v3462_v55 = vsel %vm3021_vm5, %v3461_v3, %v3460_v48  ;;  %v3394_v13 = vsel %vm3021_vm5, %v3393_v26, %v3392_v38  ;;  %v3201_v7 = vsel %vm3027_vm7, %v3200_v11, %v3199_v58 }
 0x857   :  { %v3131_v63 = vsel %vm3024_vm6, %v3130_v23, %v3129_v28  ;;  %v3464_v32 = vsel %vm3024_vm6, %v3463_v27, %v3462_v55  ;;  %v3396_v29 = vsel %vm3024_vm6, %v3395_v10, %v3394_v13  ;;  %v3529_v12 = vrot.slane %v5535_v51, 5 }
 0x858   :  { %v5558_v42 = vpop.f32.mrf.mxu1  ;;  %v3466_v22 = vsel %vm3027_vm7, %v3465_v40, %v3464_v32  ;;  %v3133_v20 = vsel %vm3027_vm7, %v3132_v15, %v3131_v63  ;;  %v3398_v40 = vsel %vm3027_vm7, %v3397_v35, %v3396_v29  ;;  %v3527_v15 = vrot.slane %v5499_v2, 6 }
 0x859   :  { %v3470_v4 = vrot.slane %v5558_v42, 7  ;;  %v3468_v49 = vsel %vm3030_vm8, %v3467_v6, %v3466_v22  ;;  %v3135_v0 = vsel %vm3030_vm8, %v3134_v31, %v3133_v20  ;;  %v3068_v6 = vrot.slane %v5535_v51, 6 }
 0x85a   :  { %v5568_v43 = vpop.f32.mrf.mxu1  ;;  %v3264_v35 = vsel %vm3018_vm4, %v3263_v8, %v3262_v44  ;;  %v3138_v27 = vrot.slane %v5558_v42, 2  ;;  %v3399_v2 = vsel %vm3030_vm8, %v5470_v59, %v3398_v40  ;;  %v3402_v3 = vrot.slane %v5558_v42, 6 }
 0x85b   :  { %v3469_v57 = vsel %vm3033_vm9, %v5568_v43, %v3468_v49  ;;  %v3136_v45 = vrot.slane %v5568_v43, 3  ;;  %v3400_v41 = vrot.slane %v5568_v43, 7  ;;  %v3266_v31 = vsel %vm3021_vm5, %v3265_v52, %v3264_v35 }
 0x85c   :  { %v3471_v53 = vsel %vm3036_vm10, %v3470_v4, %v3469_v57  ;;  %v3528_v23 = vsel %vm3018_vm4, %v3527_v15, %v3526_v19  ;;  %v3204_v48 = vrot.slane %v5568_v43, 4  ;;  %v5603_v28 = vsel %vm3036_vm10, %v3328_v17, %v5524_v54 }
 0x85d   :  { %3478 = vrot.lane.b32.xlu1 %v3471_v53, %s4343_s15  ;;  %v3137_v34 = vsel %vm3033_vm9, %v3136_v45, %v3135_v0  ;;  %v3401_v26 = vsel %vm3033_vm9, %v3400_v41, %v3399_v2  ;;  %v3067_v11 = vsel %vm3018_vm4, %v3066_v56, %v5510_v14  ;;  %v3203_v51 = vsel %vm3030_vm8, %v3202_v25, %v3201_v7 }
 0x85e   :  { %v3139_v10 = vsel %vm3036_vm10, %v3138_v27, %v3137_v34  ;;  %v3267_v38 = vsel %vm3024_vm6, %v5520_v9, %v3266_v31  ;;  %v3272_v21 = vrot.slane %v5568_v43, 5  ;;  %v3070_v55 = vrot.slane %v5520_v9, 5 }
 0x85f   :  { %v3403_v5 = vsel %vm3036_vm10, %v3402_v3, %v3401_v26  ;;  %v3076_v54 = vrot.slane %v5568_v43, 2  ;;  %v3069_v17 = vsel %vm3021_vm5, %v3068_v6, %v3067_v11  ;;  %v3332_v14 = vsel %vm3018_vm4, %v3331_v60, %v3330_v36 }
 0x860   :  { %v3530_v56 = vsel %vm3021_vm5, %v3529_v12, %v3528_v23  ;;  %v3071_v63 = vsel %vm3024_vm6, %v3070_v55, %v3069_v17  ;;  %v3334_v25 = vsel %vm3021_vm5, %v3333_v61, %v3332_v14  ;;  %v3335_v13 = vrot.slane %v5520_v9, 1 }
 0x861   :  { %3146 = vrot.lane.b32.xlu1 %v3139_v10, %s4344_s16  ;;  %v3205_v50 = vsel %vm3033_vm9, %v3204_v48, %v3203_v51  ;;  %v3531_v8 = vrot.slane %v5520_v9, 4  ;;  %v3073_v32 = vsel %vm3027_vm7, %v3072_v1, %v3071_v63  ;;  %v3340_v29 = vrot.slane %v5568_v43, 6 }
 0x862   :  { %v3269_v60 = vsel %vm3027_vm7, %v3268_v39, %v3267_v38  ;;  %v3078_v44 = vrot.slane %v5558_v42, 1  ;;  %v3075_v22 = vsel %vm3030_vm8, %v3074_v47, %v3073_v32  ;;  %v3336_v9 = vsel %vm3024_vm6, %v3335_v13, %v3334_v25 }
 0x863   :  { %v3206_v4 = vrot.slane %v5558_v42, 3  ;;  %v3532_v1 = vsel %vm3024_vm6, %v3531_v8, %v3530_v56  ;;  %v3077_v20 = vsel %vm3033_vm9, %v3076_v54, %v3075_v22  ;;  %v3337_v19 = vsel %vm3027_vm7, %v5489_v30, %v3336_v9 }
 0x864   :  { %v3533_v52 = vrot.slane %v5489_v30, 3  ;;  %v5645_v39 = vsel %vm3036_vm10, %v3078_v44, %v3077_v20  ;;  %v3339_v47 = vsel %vm3030_vm8, %v3338_v62, %v3337_v19  ;;  %v3342_v49 = vrot.slane %v5558_v42, 5 }
 0x865   :  { %3410 = vrot.lane.b32.xlu1 %v3403_v5, %s4344_s16  ;;  %v3207_v58 = vsel %vm3036_vm10, %v3206_v4, %v3205_v50  ;;  %v3271_v57 = vsel %vm3030_vm8, %v3270_v37, %v3269_v60  ;;  %v3341_v45 = vsel %vm3033_vm9, %v3340_v29, %v3339_v47  ;;  %v3537_v41 = vrot.slane %v5568_v43, 1 }
 0x866   :  { %v3273_v30 = vsel %vm3033_vm9, %v3272_v21, %v3271_v57  ;;  %v3534_v40 = vsel %vm3027_vm7, %v3533_v52, %v3532_v1  ;;  %v3343_v62 = vsel %vm3036_vm10, %v3342_v49, %v3341_v45  ;;  %v3274_v15 = vrot.slane %v5558_v42, 4 }
 0x867   :  { %v3535_v36 = vrot.slane %v5470_v59, 2 }
 0x868   :  { %v3275_v53 = vsel %vm3036_vm10, %v3274_v15, %v3273_v30 }
 0x869   :  { %3214 = vrot.lane.b32.xlu1 %v3207_v58, %s4343_s15  ;;  %v3536_v37 = vsel %vm3030_vm8, %v3535_v36, %v3534_v40 }
 0x86a   :  { %v3538_v0 = vsel %vm3033_vm9, %v3537_v41, %v3536_v37 }
 0x86b   :  { %v3539_v6 = vsel %vm3036_vm10, %v5558_v42, %v3538_v0 }
 0x86d   :  { %3282 = vrot.lane.b32.xlu1 %v3275_v53, %s4342_s7 }
 0x871   :  { %3546 = vrot.lane.b32.xlu1 %v3539_v6, %s4342_s7 }
 0x883   :  { %v3473_v43 = vpop.permute.xlu0 %3472 }
 0x887   :  { %v3141_v61 = vpop.permute.xlu0 %3140 }
 0x888   :  { %v3552_v31 = vsel %vm78_vm0, %v5440_v33, %v3141_v61 }
 0x88b   :  { %v3405_v34 = vpop.permute.xlu0 %3404 }
 0x88c   :  { %v3566_v7 = vsel %vm78_vm0, %v5451_v46, %v3405_v34 }
 0x88d   :  { %v3570_v26 = vsel %vm3556_vm11, %v3566_v7, %v3473_v43 }
 0x88f   :  { %v3475_v35 = vpop.permute.xlu1 %3474  ;;  %v3209_v27 = vpop.permute.xlu0 %3208 }
 0x890   :  { %v3557_v12 = vsel %vm3556_vm11, %v3552_v31, %v3209_v27 }
 0x893   :  { %v3143_v2 = vpop.permute.xlu1 %3142  ;;  %v3277_v59 = vpop.permute.xlu0 %3276 }
 0x894   :  { %v3562_v23 = vsel %vm3561_vm12, %v3557_v12, %v3277_v59  ;;  %v3553_v33 = vsel %vm78_vm0, %v5465_v18, %v3143_v2 }
 0x897   :  { %v3407_v42 = vpop.permute.xlu1 %3406  ;;  %v3541_v3 = vpop.permute.xlu0 %3540 }
 0x898   :  { %v3574_v10 = vsel %vm3561_vm12, %v3570_v26, %v3541_v3  ;;  %v3567_v38 = vsel %vm78_vm0, %v5492_v16, %v3407_v42 }
 0x899   :  { %v3578_v48 = vadd.f32 %v3574_v10, %v3562_v23  ;;  %v3571_v5 = vsel %vm3556_vm11, %v3567_v38, %v3475_v35 }
 0x89b   :  { %v3211_v11 = vpop.permute.xlu1 %3210  ;;  %3579 = vadd.xlane.f32.xlu0 %v3578_v48 }
 0x89c   :  { %v3558_v55 = vsel %vm3556_vm11, %v3553_v33, %v3211_v11 }
 0x89e   :  { %v3477_v51 = vpop.permute.xlu0 %3476 }
 0x89f   :  { %v3279_v46 = vpop.permute.xlu1 %3278 }
 0x8a0   :  { %v3563_v17 = vsel %vm3561_vm12, %v3558_v55, %v3279_v46 }
 0x8a2   :  { %v3145_v21 = vpop.permute.xlu0 %3144 }
 0x8a3   :  { %v3543_v54 = vpop.permute.xlu1 %3542  ;;  %v3554_v18 = vsel %vm78_vm0, %v5502_v24, %v3145_v21 }
 0x8a4   :  { %v3575_v14 = vsel %vm3561_vm12, %v3571_v5, %v3543_v54 }
 0x8a5   :  { %v3581_v56 = vadd.f32 %v3575_v14, %v3563_v17 }
 0x8a6   :  { %v3409_v63 = vpop.permute.xlu0 %3408 }
 0x8a7   :  { %3582 = vadd.xlane.f32.xlu1 %v3581_v56  ;;  %v3568_v16 = vsel %vm78_vm0, %v5603_v28, %v3409_v63 }
 0x8a8   :  { %v3572_v8 = vsel %vm3556_vm11, %v3568_v16, %v3477_v51 }
 0x8aa   :  { %v3213_v25 = vpop.permute.xlu0 %3212 }
 0x8ab   :  { %v3559_v50 = vsel %vm3556_vm11, %v3554_v18, %v3213_v25 }
 0x8ae   :  { %v3281_v13 = vpop.permute.xlu0 %3280 }
 0x8af   :  { %v3564_v29 = vsel %vm3561_vm12, %v3559_v50, %v3281_v13 }
 0x8b2   :  { %v3545_v32 = vpop.permute.xlu0 %3544 }
 0x8b3   :  { %v3576_v60 = vsel %vm3561_vm12, %v3572_v8, %v3545_v32 }
 0x8b4   :  { %v3584_v44 = vadd.f32 %v3576_v60, %v3564_v29 }
 0x8b6   :  { %3585 = vadd.xlane.f32.xlu0 %v3584_v44 }
 0x8cf   :  { %v3479_v22 = vpop.permute.xlu1 %3478 }
 0x8d3   :  { %v3147_v9 = vpop.permute.xlu1 %3146 }
 0x8d4   :  { %v3555_v24 = vsel %vm78_vm0, %v5645_v39, %v3147_v9 }
 0x8d7   :  { %v3411_v4 = vpop.permute.xlu1 %3410 }
 0x8d8   :  { %v3569_v28 = vsel %vm78_vm0, %v3343_v62, %v3411_v4 }
 0x8d9   :  { %v3573_v52 = vsel %vm3556_vm11, %v3569_v28, %v3479_v22 }
 0x8db   :  { %v3215_v1 = vpop.permute.xlu1 %3214 }
 0x8dc   :  { %v3560_v19 = vsel %vm3556_vm11, %v3555_v24, %v3215_v1 }
 0x8df   :  { %v3283_v20 = vpop.permute.xlu1 %3282 }
 0x8e0   :  { %v3565_v49 = vsel %vm3561_vm12, %v3560_v19, %v3283_v20 }
 0x8e3   :  { %v3547_v47 = vpop.permute.xlu1 %3546 }
 0x8e4   :  { %v3577_v58 = vsel %vm3561_vm12, %v3573_v52, %v3547_v47 }
 0x8e5   :  { %v3587_v57 = vadd.f32 %v3577_v58, %v3565_v49 }
 0x8e7   :  { %3588 = vadd.xlane.f32.xlu0 %v3587_v57 }
 0x924   :  { %v3580_v45 = vpop.xlane.xlu0 %3579 }
 0x930   :  { %v3583_v34 = vpop.xlane.xlu1 %3582 }
 0x93f   :  { %v3586_v30 = vpop.xlane.xlu0 %3585 }
 0x940   :  { %v3590_v40 = vadd.f32 %v3586_v30, %v3580_v45 }
 0x942   :  { %v3593_v41 = vmul.f32 0.001953125, %v3590_v40 }
 0x944   :  { %v3595_v15 = vsub.f32 %v3562_v23, %v3593_v41  ;;  %v3596_v62 = vsub.f32 %v3574_v10, %v3593_v41  ;;  %v3599_v36 = vsub.f32 %v3564_v29, %v3593_v41  ;;  %v3600_v53 = vsub.f32 %v3576_v60, %v3593_v41 }
 0x946   :  { %v3603_v39 = vmul.f32 %v3595_v15, %v3595_v15  ;;  %v3604_v37 = vmul.f32 %v3596_v62, %v3596_v62  ;;  %v3607_v6 = vmul.f32 %v3599_v36, %v3599_v36  ;;  %v3608_v43 = vmul.f32 %v3600_v53, %v3600_v53 }
 0x948   :  { %v3611_v0 = vadd.f32 %v3604_v37, %v3603_v39  ;;  %v3617_v61 = vadd.f32 %v3608_v43, %v3607_v6 }
 0x94a   :  { %3612 = vadd.xlane.f32.xlu0 %v3611_v0 }
 0x94e   :  { %3618 = vadd.xlane.f32.xlu0 %v3617_v61 }
 0x970   :  { %v3589_v35 = vpop.xlane.xlu0 %3588 }
 0x971   :  { %v3591_v27 = vadd.f32 %v3589_v35, %v3583_v34 }
 0x973   :  { %v3594_v2 = vmul.f32 0.001953125, %v3591_v27 }
 0x975   :  { %v3597_v59 = vsub.f32 %v3563_v17, %v3594_v2  ;;  %v3598_v7 = vsub.f32 %v3575_v14, %v3594_v2  ;;  %v3601_v31 = vsub.f32 %v3565_v49, %v3594_v2  ;;  %v3602_v12 = vsub.f32 %v3577_v58, %v3594_v2 }
 0x977   :  { %v3605_v42 = vmul.f32 %v3597_v59, %v3597_v59  ;;  %v3606_v26 = vmul.f32 %v3598_v7, %v3598_v7  ;;  %v3609_v23 = vmul.f32 %v3601_v31, %v3601_v31  ;;  %v3610_v10 = vmul.f32 %v3602_v12, %v3602_v12 }
 0x979   :  { %v3614_v3 = vadd.f32 %v3606_v26, %v3605_v42  ;;  %v3620_v48 = vadd.f32 %v3610_v10, %v3609_v23 }
 0x97b   :  { %3615 = vadd.xlane.f32.xlu1 %v3614_v3 }
 0x97f   :  { %3621 = vadd.xlane.f32.xlu1 %v3620_v48 }
 0x9d3   :  { %v3613_v11 = vpop.xlane.xlu0 %3612 }
 0x9d7   :  { %v3619_v51 = vpop.xlane.xlu0 %3618 }
 0x9d8   :  { %v3623_v46 = vadd.f32 %v3619_v51, %v3613_v11 }
 0x9da   :  { %v3625_v38 = vmul.f32 0.001953125, %v3623_v46 }
 0x9dc   :  { %v3627_v33 = vadd.f32 1e-05, %v3625_v38 }
 0x9de   :  { %4289 = vrsqrt.f32 %v3627_v33 }
 0x9eb   :  { %v4290_v21 = vpop.eup %4289 }
 0x9ec   :  { %v3631_v55 = vmul.f32 %v4290_v21, %v3595_v15  ;;  %v3632_v5 = vmul.f32 %v4290_v21, %v3596_v62  ;;  %v3635_v54 = vmul.f32 %v4290_v21, %v3599_v36  ;;  %v3636_v17 = vmul.f32 %v4290_v21, %v3600_v53 }
 0x9ee   :  { %3639 = vst [vmem:[%s5733_s8] sm:$0xff] %v3631_v55  ;;  %3640 = vst [vmem:[%s5733_s8 + $0x8] sm:$0xff] %v3632_v5 }
 0x9ef   :  { %3643 = vst [vmem:[%s5733_s8 + $0x20] sm:$0xff] %v3635_v54  ;;  %3644 = vst [vmem:[%s5733_s8 + $0x28] sm:$0xff] %v3636_v17 }
 0xa04   :  { %v3616_v14 = vpop.xlane.xlu1 %3615 }
 0xa08   :  { %v3622_v56 = vpop.xlane.xlu1 %3621 }
 0xa09   :  { %v3624_v63 = vadd.f32 %v3622_v56, %v3616_v14 }
 0xa0b   :  { %v3626_v25 = vmul.f32 0.001953125, %v3624_v63 }
 0xa0d   :  { %v3628_v13 = vadd.f32 1e-05, %v3626_v25 }
 0xa0f   :  { %4291 = vrsqrt.f32 %v3628_v13 }
 0xa1c   :  { %v4292_v16 = vpop.eup %4291 }
 0xa1d   :  { %v3633_v18 = vmul.f32 %v4292_v16, %v3597_v59  ;;  %v3634_v50 = vmul.f32 %v4292_v16, %v3598_v7  ;;  %v3637_v8 = vmul.f32 %v4292_v16, %v3601_v31  ;;  %v3638_v32 = vmul.f32 %v4292_v16, %v3602_v12 }
 0xa1f   :  { %3641 = vst [vmem:[%s5733_s8 + $0x10] sm:$0xff] %v3633_v18  ;;  %3642 = vst [vmem:[%s5733_s8 + $0x18] sm:$0xff] %v3634_v50 }
 0xa20   :  { %3645 = vst [vmem:[%s5733_s8 + $0x30] sm:$0xff] %v3637_v8  ;;  %3646 = vst [vmem:[%s5733_s8 + $0x38] sm:$0xff] %v3638_v32 }
 0xa21   :  { %3651 = vsyncpa [#allocation3], 1 }
 0xa22   :  { %3652 = vsyncpa [#allocation5], 1 }

</bundles_post_ra>
